<compile_context>
chip_gen: v6e
topology: v6e:2x2x1
jax: 0.10.0
libtpu: 0.0.40
codegen_flags: <defaults>
</compile_context>

<pallas_src>
import math

import jax
import jax.numpy as jnp
from jax import lax
from jax.experimental import pallas as pl
from jax.experimental.pallas import tpu as pltpu

# ---- model hyper-parameters (what `opt.model` would carry) -----------------
D_MODEL = 32
N_HEADS = 4
D_K = D_MODEL // N_HEADS
D_FF = 64
EPS = 1e-6

BATCH = 2
SEQ = 8       # target sequence length
SEQ_ENC = 8   # encoder (source) sequence length

BS = BATCH * SEQ        # flattened decoder rows
BSE = BATCH * SEQ_ENC   # flattened encoder rows

# ---------------- activation/mask slab layout (A_ROWS x A_LANES) ------------
A_X = 0
A_ENC = A_X + BS
A_TB = A_ENC + BSE           # tgt additive bias (BS, BS) in lanes 0:BS
A_SB = A_TB + BS             # src additive bias (BS, BSE) in lanes 0:BSE
A_ROWS = A_SB + BS
A_LANES = max(D_MODEL, BS, BSE)

# ---------------- weight slab layout (W_ROWS x W_LANES) ---------------------
# per-(head, tensor) projection bands: D_MODEL rows each, lanes 0:D_K
W_SA_Q = 0
W_SA_K = W_SA_Q + N_HEADS * D_MODEL
W_SA_V = W_SA_K + N_HEADS * D_MODEL
W_CA_Q = W_SA_V + N_HEADS * D_MODEL
W_CA_K = W_CA_Q + N_HEADS * D_MODEL
W_CA_V = W_CA_K + N_HEADS * D_MODEL
W_SA_O = W_CA_V + N_HEADS * D_MODEL     # (D_MODEL, D_MODEL)
W_CA_O = W_SA_O + D_MODEL               # (D_MODEL, D_MODEL)
W_FF1 = W_CA_O + D_MODEL                # (D_MODEL, D_FF)
W_FF2 = W_FF1 + D_MODEL                 # (D_FF, D_MODEL)
W_ROWS = W_FF2 + D_FF
W_LANES = max(D_FF, D_MODEL)

# ---------------- bias / LN slab layout (B_ROWS x B_LANES) ------------------
# per-head projection biases pre-stacked so each head band is already (rows, D_K)
B_SA_Q = 0
B_SA_K = B_SA_Q + N_HEADS * BS
B_SA_V = B_SA_K + N_HEADS * BS
B_CA_Q = B_SA_V + N_HEADS * BS
B_CA_K = B_CA_Q + N_HEADS * BS
B_CA_V = B_CA_K + N_HEADS * BSE
B_VEC0 = B_CA_V + N_HEADS * BSE          # single (1, D)-style rows, 8-aligned
(B_SA_O, B_CA_O, B_FF1, B_FF2,
 B_LN1A, B_LN1B, B_LN2A, B_LN2B, B_LN3A, B_LN3B) = (B_VEC0 + 8 * i for i in range(10))
B_ROWS = B_VEC0 + 8 * 10
B_LANES = max(D_FF, D_MODEL)


# ---------------------------- Pallas kernel ---------------------------------
def _decoder_block_kernel(act_ref, w_ref, b_ref, out_ref):
    f32 = jnp.float32

    x = act_ref[A_X:A_X + BS, 0:D_MODEL]
    enc = act_ref[A_ENC:A_ENC + BSE, 0:D_MODEL]
    tbias = act_ref[A_TB:A_TB + BS, 0:BS]
    sbias = act_ref[A_SB:A_SB + BS, 0:BSE]

    def vec(row, width=D_MODEL):                 # (1, width), 8-aligned row
        return b_ref[row:row + 1, 0:width]

    def layer_norm(h, a_row, b_row):
        mean = jnp.mean(h, axis=-1, keepdims=True)
        diff = h - mean
        # torch.std: unbiased (divide by D-1); eps added to std (not variance)
        var = jnp.sum(diff * diff, axis=-1, keepdims=True) * (1.0 / (D_MODEL - 1))
        std = jnp.sqrt(var)
        return vec(a_row) * (diff * pl.reciprocal(std + EPS)) + vec(b_row)

    def attention(q_in, kv_in, kv_rows, wq, wk, wv, wo, bq, bk, bv, bo_row, bias):
        # Per-(head, tensor) projections.  Each weight band lives at lane
        # offset 0 of its own sublane block, so every matmul output is already
        # lane-aligned: no width-8 lane slices / rotates.  Q is pre-scaled by
        # 1/sqrt(d_k) via the folded weights.
        s_blocks = []
        v_heads = []
        for h in range(N_HEADS):                 # static unrolled loop
            q_h = (jnp.dot(q_in, w_ref[wq + h * D_MODEL:wq + (h + 1) * D_MODEL, 0:D_K],
                           preferred_element_type=f32)
                   + b_ref[bq + h * BS:bq + (h + 1) * BS, 0:D_K])
            k_h = (jnp.dot(kv_in, w_ref[wk + h * D_MODEL:wk + (h + 1) * D_MODEL, 0:D_K],
                           preferred_element_type=f32)
                   + b_ref[bk + h * kv_rows:bk + (h + 1) * kv_rows, 0:D_K])
            v_h = (jnp.dot(kv_in, w_ref[wv + h * D_MODEL:wv + (h + 1) * D_MODEL, 0:D_K],
                           preferred_element_type=f32)
                   + b_ref[bv + h * kv_rows:bv + (h + 1) * kv_rows, 0:D_K])
            # scores = q_h @ k_h^T (contract over d_k, no explicit transpose)
            s_h = lax.dot_general(q_h, k_h, (((1,), (1,)), ((), ())),
                                  preferred_element_type=f32) + bias
            s_blocks.append(s_h)
            v_heads.append(v_h)

        # Heads stacked on sublanes -> ONE softmax (single max/exp/sum/recip
        # instead of N_HEADS of each).
        s_st = jnp.concatenate(s_blocks, axis=0)            # (H*BS, kv_rows)
        m = jnp.max(s_st, axis=-1, keepdims=True)
        e = jnp.exp(s_st - m)
        p_st = e * pl.reciprocal(jnp.sum(e, axis=-1, keepdims=True))

        # Per-head PV, accumulated through the matching W_o row band
        # (replaces the head concat + full (D, D) matmul).
        acc = jnp.zeros((BS, D_MODEL), f32)
        for h in range(N_HEADS):
            p_h = p_st[h * BS:(h + 1) * BS, :]               # sublane-aligned slice
            head = jnp.dot(p_h, v_heads[h], preferred_element_type=f32)
            acc = acc + jnp.dot(head, w_ref[wo + h * D_K:wo + (h + 1) * D_K, 0:D_MODEL],
                                preferred_element_type=f32)
        return acc + vec(bo_row)

    # residual connection 0: self-attention (pre-norm)
    xn = layer_norm(x, B_LN1A, B_LN1B)
    x = x + attention(xn, xn, BS, W_SA_Q, W_SA_K, W_SA_V, W_SA_O,
                      B_SA_Q, B_SA_K, B_SA_V, B_SA_O, tbias)

    # residual connection 1: cross-attention with encoder output
    xn = layer_norm(x, B_LN2A, B_LN2B)
    x = x + attention(xn, enc, BSE, W_CA_Q, W_CA_K, W_CA_V, W_CA_O,
                      B_CA_Q, B_CA_K, B_CA_V, B_CA_O, sbias)

    # residual connection 2: feed-forward
    xn = layer_norm(x, B_LN3A, B_LN3B)
    hid = jnp.maximum(
        jnp.dot(xn, w_ref[W_FF1:W_FF1 + D_MODEL, 0:D_FF],
                preferred_element_type=f32) + vec(B_FF1, D_FF), 0.0)
    x = x + jnp.dot(hid, w_ref[W_FF2:W_FF2 + D_FF, 0:D_MODEL],
                    preferred_element_type=f32) + vec(B_FF2)

    out_ref[...] = x


# ---------------------------- wrapper ----------------------------------------
def _block_diag_bias(mask, batch):
    """(S, T) 0/1 mask -> (B*S, B*T) additive bias; masked & cross-batch = -1e9."""
    s, t = mask.shape
    bias = jnp.where(mask == 0.0, -1e9, 0.0).astype(jnp.float32)          # (S, T)
    same = (jnp.arange(batch)[:, None] == jnp.arange(batch)[None, :])     # (B, B)
    full = jnp.where(same[:, None, :, None], bias[None, :, None, :], -1e9)
    return full.reshape(batch * s, batch * t).astype(jnp.float32)


def _put(slab, row, arr):
    r, c = arr.shape
    return slab.at[row:row + r, 0:c].set(arr.astype(jnp.float32))


def _head_band(bias_row, rows_per_head):
    """(1, D_MODEL) bias -> (N_HEADS*rows_per_head, D_K), head h repeated."""
    b = bias_row.reshape(N_HEADS, 1, D_K)
    return jnp.broadcast_to(b, (N_HEADS, rows_per_head, D_K)).reshape(
        N_HEADS * rows_per_head, D_K)


def _pack_params(p):
    """Fold 1/sqrt(d_k) into W_q/b_q and pack all params into 2 slabs."""
    scale = 1.0 / math.sqrt(D_K)
    sa_wq = p["sa_wq"] * scale
    ca_wq = p["ca_wq"] * scale
    sa_bq = p["sa_bq"] * scale
    ca_bq = p["ca_bq"] * scale

    wslab = jnp.zeros((W_ROWS, W_LANES), jnp.float32)
    for h in range(N_HEADS):
        lo = h * D_K
        wslab = _put(wslab, W_SA_Q + h * D_MODEL, sa_wq[:, lo:lo + D_K])
        wslab = _put(wslab, W_SA_K + h * D_MODEL, p["sa_wk"][:, lo:lo + D_K])
        wslab = _put(wslab, W_SA_V + h * D_MODEL, p["sa_wv"][:, lo:lo + D_K])
        wslab = _put(wslab, W_CA_Q + h * D_MODEL, ca_wq[:, lo:lo + D_K])
        wslab = _put(wslab, W_CA_K + h * D_MODEL, p["ca_wk"][:, lo:lo + D_K])
        wslab = _put(wslab, W_CA_V + h * D_MODEL, p["ca_wv"][:, lo:lo + D_K])
    wslab = _put(wslab, W_SA_O, p["sa_wo"])
    wslab = _put(wslab, W_CA_O, p["ca_wo"])
    wslab = _put(wslab, W_FF1, p["ff_w1"])
    wslab = _put(wslab, W_FF2, p["ff_w2"])

    bslab = jnp.zeros((B_ROWS, B_LANES), jnp.float32)
    bslab = _put(bslab, B_SA_Q, _head_band(sa_bq, BS))
    bslab = _put(bslab, B_SA_K, _head_band(p["sa_bk"], BS))
    bslab = _put(bslab, B_SA_V, _head_band(p["sa_bv"], BS))
    bslab = _put(bslab, B_CA_Q, _head_band(ca_bq, BS))
    bslab = _put(bslab, B_CA_K, _head_band(p["ca_bk"], BSE))
    bslab = _put(bslab, B_CA_V, _head_band(p["ca_bv"], BSE))
    vec_rows = [p["sa_bo"], p["ca_bo"], p["ff_b1"], p["ff_b2"],
                p["ln1_a"], p["ln1_b"], p["ln2_a"], p["ln2_b"],
                p["ln3_a"], p["ln3_b"]]
    for i, v in enumerate(vec_rows):
        bslab = _put(bslab, B_VEC0 + 8 * i, v)
    return wslab, bslab


def _pack_acts(x_flat, enc_flat, tbias, sbias):
    a = jnp.zeros((A_ROWS, A_LANES), jnp.float32)
    a = a.at[A_X:A_X + BS, 0:D_MODEL].set(x_flat)
    a = a.at[A_ENC:A_ENC + BSE, 0:D_MODEL].set(enc_flat)
    a = a.at[A_TB:A_TB + BS, 0:BS].set(tbias)
    a = a.at[A_SB:A_SB + BS, 0:BSE].set(sbias)
    return a


def decoder_block_pallas(x, enc, tgt_mask, src_mask, params):
    B, S, D = x.shape
    Se = enc.shape[1]

    act = _pack_acts(x.reshape(B * S, D).astype(jnp.float32),
                     enc.reshape(B * Se, D).astype(jnp.float32),
                     _block_diag_bias(tgt_mask, B),
                     _block_diag_bias(src_mask, B))
    wslab, bslab = _pack_params(params)

    def full_spec(shape):
        nd = len(shape)
        return pl.BlockSpec(shape, lambda i, _nd=nd: (0,) * _nd)

    args = (act, wslab, bslab)
    out = pl.pallas_call(
        _decoder_block_kernel,
        out_shape=jax.ShapeDtypeStruct((B * S, D), jnp.float32),
        grid_spec=pltpu.PrefetchScalarGridSpec(
            num_scalar_prefetch=0,
            grid=(1,),
            in_specs=[full_spec(a.shape) for a in args],
            out_specs=full_spec((B * S, D)),
        ),
        compiler_params=pltpu.CompilerParams(
            dimension_semantics=("arbitrary",)),
    )(*args)
    return out.reshape(B, S, D)


# ---------------- pure-JAX reference (mirrors the PyTorch math) -------------
def decoder_block_ref(x, enc, tgt_mask, src_mask, p):
    def ln(h, a, b):
        mean = h.mean(-1, keepdims=True)
        diff = h - mean
        std = jnp.sqrt((diff * diff).sum(-1, keepdims=True) / (D_MODEL - 1))
        return a * diff / (std + EPS) + b

    def mha(q_in, kv_in, wq, bq, wk, bk, wv, bv, wo, bo, mask):
        B, S, _ = q_in.shape
        Skv = kv_in.shape[1]
        Q = (q_in @ wq + bq).reshape(B, S, N_HEADS, D_K).transpose(0, 2, 1, 3)
        K = (kv_in @ wk + bk).reshape(B, Skv, N_HEADS, D_K).transpose(0, 2, 1, 3)
        V = (kv_in @ wv + bv).reshape(B, Skv, N_HEADS, D_K).transpose(0, 2, 1, 3)
        scores = jnp.einsum("bhqd,bhkd->bhqk", Q, K) / math.sqrt(D_K)
        scores = jnp.where(mask[None, None] == 0.0, -1e9, scores)
        attn = jax.nn.softmax(scores, axis=-1)
        out = jnp.einsum("bhqk,bhkd->bhqd", attn, V)
        out = out.transpose(0, 2, 1, 3).reshape(B, S, D_MODEL)
        return out @ wo + bo

    xn = ln(x, p["ln1_a"], p["ln1_b"])
    x = x + mha(xn, xn, p["sa_wq"], p["sa_bq"], p["sa_wk"], p["sa_bk"],
                p["sa_wv"], p["sa_bv"], p["sa_wo"], p["sa_bo"], tgt_mask)
    xn = ln(x, p["ln2_a"], p["ln2_b"])
    x = x + mha(xn, enc, p["ca_wq"], p["ca_bq"], p["ca_wk"], p["ca_bk"],
                p["ca_wv"], p["ca_bv"], p["ca_wo"], p["ca_bo"], src_mask)
    xn = ln(x, p["ln3_a"], p["ln3_b"])
    hidden = jnp.maximum(xn @ p["ff_w1"] + p["ff_b1"], 0.0)
    x = x + hidden @ p["ff_w2"] + p["ff_b2"]
    return x


def make_params(key):
    keys = jax.random.split(key, 32)
    ki = iter(keys)

    def w(shape, scale=0.05):
        return (scale * jax.random.normal(next(ki), shape)).astype(jnp.float32)

    p = {}
    for pre in ("sa", "ca"):
        for name in ("q", "k", "v", "o"):
            # nn.Linear weight is (out, in); we store it pre-transposed -> (in, out)
            p[f"{pre}_w{name}"] = w((D_MODEL, D_MODEL))
            p[f"{pre}_b{name}"] = w((1, D_MODEL), 0.02)
    p["ff_w1"] = w((D_MODEL, D_FF))
    p["ff_b1"] = w((1, D_FF), 0.02)
    p["ff_w2"] = w((D_FF, D_MODEL))
    p["ff_b2"] = w((1, D_MODEL), 0.02)
    for i in (1, 2, 3):
        # alpha initialized to ones, beta to zeros (as in the PyTorch module)
        p[f"ln{i}_a"] = jnp.ones((1, D_MODEL), jnp.float32)
        p[f"ln{i}_b"] = jnp.zeros((1, D_MODEL), jnp.float32)
    return p


if __name__ == "__main__":
    key = jax.random.PRNGKey(0)
    k_x, k_enc, k_p = jax.random.split(key, 3)

    x = jax.random.normal(k_x, (BATCH, SEQ, D_MODEL), dtype=jnp.float32)
    enc_out = jax.random.normal(k_enc, (BATCH, SEQ_ENC, D_MODEL), dtype=jnp.float32)

    # causal target mask (1 = keep, 0 = masked); full source mask
    tgt_mask = jnp.tril(jnp.ones((SEQ, SEQ), jnp.float32))
    src_mask = jnp.ones((SEQ, SEQ_ENC), jnp.float32)

    params = make_params(k_p)

    decoder_fn = jax.jit(decoder_block_pallas)
    out = decoder_fn(x, enc_out, tgt_mask, src_mask, params)
    out = jax.block_until_ready(out)

    ref = decoder_block_ref(x, enc_out, tgt_mask, src_mask, params)
    assert out.shape == (BATCH, SEQ, D_MODEL)
    assert jnp.allclose(out, ref, atol=1e-4, rtol=1e-4), \
        f"max abs diff {jnp.max(jnp.abs(out - ref))}"

    print("KERNEL_OK")
</pallas_src>

<mosaic_0001>
module attributes {stable_mosaic.version = 11 : i64} {
  func.func @_decoder_block_kernel(%arg0: i32, %arg1: memref<64x32xf32, #tpu.memory_space<vmem>>, %arg2: memref<928x64xf32, #tpu.memory_space<vmem>>, %arg3: memref<464x64xf32, #tpu.memory_space<vmem>>, %arg4: memref<16x32xf32, #tpu.memory_space<vmem>>) attributes {dimension_semantics = [#tpu.dimension_semantics<arbitrary>], iteration_bounds = array<i64: 1>, scalar_prefetch = 0 : i64, scratch_operands = 0 : i64, tpu.core_type = #tpu.core_type<tc>, window_params = [{pipeline_mode = #tpu.pipeline_mode<synchronous>, transform_indices = @transform_0, window_bounds = array<i64: 64, 32>}, {pipeline_mode = #tpu.pipeline_mode<synchronous>, transform_indices = @transform_1, window_bounds = array<i64: 928, 64>}, {pipeline_mode = #tpu.pipeline_mode<synchronous>, transform_indices = @transform_2, window_bounds = array<i64: 464, 64>}, {pipeline_mode = #tpu.pipeline_mode<synchronous>, transform_indices = @transform_3, window_bounds = array<i64: 16, 32>}]} {
    %c0 = arith.constant 0 : index
    %c0_0 = arith.constant 0 : index
    %0 = vector.load %arg1[%c0, %c0_0] : memref<64x32xf32, #tpu.memory_space<vmem>>, vector<16x32xf32>
    %c16 = arith.constant 16 : index
    %c0_1 = arith.constant 0 : index
    %1 = vector.load %arg1[%c16, %c0_1] : memref<64x32xf32, #tpu.memory_space<vmem>>, vector<16x32xf32>
    %c32 = arith.constant 32 : index
    %c0_2 = arith.constant 0 : index
    %2 = vector.load %arg1[%c32, %c0_2] : memref<64x32xf32, #tpu.memory_space<vmem>>, vector<16x16xf32>
    %c48 = arith.constant 48 : index
    %c0_3 = arith.constant 0 : index
    %3 = vector.load %arg1[%c48, %c0_3] : memref<64x32xf32, #tpu.memory_space<vmem>>, vector<16x16xf32>
    %cst = arith.constant dense<0.000000e+00> : vector<16xf32>
    %4 = vector.multi_reduction <add>, %0, %cst [1] : vector<16x32xf32> to vector<16xf32>
    %5 = vector.shape_cast %4 : vector<16xf32> to vector<16x1xf32>
    %cst_4 = arith.constant 3.200000e+01 : f32
    %6 = vector.broadcast %cst_4 : f32 to vector<16x1xf32>
    %7 = arith.divf %5, %6 : vector<16x1xf32>
    %8 = vector.broadcast %7 : vector<16x1xf32> to vector<16x32xf32>
    %9 = arith.subf %0, %8 : vector<16x32xf32>
    %10 = arith.mulf %9, %9 : vector<16x32xf32>
    %cst_5 = arith.constant dense<0.000000e+00> : vector<16xf32>
    %11 = vector.multi_reduction <add>, %10, %cst_5 [1] : vector<16x32xf32> to vector<16xf32>
    %12 = vector.shape_cast %11 : vector<16xf32> to vector<16x1xf32>
    %cst_6 = arith.constant 0.0322580636 : f32
    %13 = vector.broadcast %cst_6 : f32 to vector<16x1xf32>
    %14 = arith.mulf %12, %13 : vector<16x1xf32>
    %15 = math.sqrt %14 : vector<16x1xf32>
    %c416 = arith.constant 416 : index
    %c0_7 = arith.constant 0 : index
    %16 = vector.load %arg3[%c416, %c0_7] : memref<464x64xf32, #tpu.memory_space<vmem>>, vector<1x32xf32>
    %cst_8 = arith.constant 9.99999997E-7 : f32
    %17 = vector.broadcast %cst_8 : f32 to vector<16x1xf32>
    %18 = arith.addf %15, %17 : vector<16x1xf32>
    %19 = tpu.reciprocal %18 : vector<16x1xf32> -> vector<16x1xf32>
    %20 = vector.broadcast %19 : vector<16x1xf32> to vector<16x32xf32>
    %21 = arith.mulf %9, %20 : vector<16x32xf32>
    %22 = vector.broadcast %16 : vector<1x32xf32> to vector<16x32xf32>
    %23 = arith.mulf %22, %21 : vector<16x32xf32>
    %c424 = arith.constant 424 : index
    %c0_9 = arith.constant 0 : index
    %24 = vector.load %arg3[%c424, %c0_9] : memref<464x64xf32, #tpu.memory_space<vmem>>, vector<1x32xf32>
    %25 = vector.broadcast %24 : vector<1x32xf32> to vector<16x32xf32>
    %26 = arith.addf %23, %25 : vector<16x32xf32>
    %c0_10 = arith.constant 0 : index
    %c0_11 = arith.constant 0 : index
    %27 = vector.load %arg2[%c0_10, %c0_11] : memref<928x64xf32, #tpu.memory_space<vmem>>, vector<32x8xf32>
    %cst_12 = arith.constant dense<0.000000e+00> : vector<16x8xf32>
    %28 = tpu.matmul %26, %27, %cst_12 {dimension_numbers = #tpu.dot_dimension_numbers<[1], [0], [0], [1], [0, 0, 1, 1], [], []>} : vector<16x32xf32>, vector<32x8xf32>, vector<16x8xf32> -> vector<16x8xf32>
    %c0_13 = arith.constant 0 : index
    %c0_14 = arith.constant 0 : index
    %29 = vector.load %arg3[%c0_13, %c0_14] : memref<464x64xf32, #tpu.memory_space<vmem>>, vector<16x8xf32>
    %30 = arith.addf %28, %29 : vector<16x8xf32>
    %c128 = arith.constant 128 : index
    %c0_15 = arith.constant 0 : index
    %31 = vector.load %arg2[%c128, %c0_15] : memref<928x64xf32, #tpu.memory_space<vmem>>, vector<32x8xf32>
    %cst_16 = arith.constant dense<0.000000e+00> : vector<16x8xf32>
    %32 = tpu.matmul %26, %31, %cst_16 {dimension_numbers = #tpu.dot_dimension_numbers<[1], [0], [0], [1], [0, 0, 1, 1], [], []>} : vector<16x32xf32>, vector<32x8xf32>, vector<16x8xf32> -> vector<16x8xf32>
    %c64 = arith.constant 64 : index
    %c0_17 = arith.constant 0 : index
    %33 = vector.load %arg3[%c64, %c0_17] : memref<464x64xf32, #tpu.memory_space<vmem>>, vector<16x8xf32>
    %34 = arith.addf %32, %33 : vector<16x8xf32>
    %c256 = arith.constant 256 : index
    %c0_18 = arith.constant 0 : index
    %35 = vector.load %arg2[%c256, %c0_18] : memref<928x64xf32, #tpu.memory_space<vmem>>, vector<32x8xf32>
    %cst_19 = arith.constant dense<0.000000e+00> : vector<16x8xf32>
    %36 = tpu.matmul %26, %35, %cst_19 {dimension_numbers = #tpu.dot_dimension_numbers<[1], [0], [0], [1], [0, 0, 1, 1], [], []>} : vector<16x32xf32>, vector<32x8xf32>, vector<16x8xf32> -> vector<16x8xf32>
    %c128_20 = arith.constant 128 : index
    %c0_21 = arith.constant 0 : index
    %37 = vector.load %arg3[%c128_20, %c0_21] : memref<464x64xf32, #tpu.memory_space<vmem>>, vector<16x8xf32>
    %38 = arith.addf %36, %37 : vector<16x8xf32>
    %cst_22 = arith.constant dense<0.000000e+00> : vector<16x16xf32>
    %39 = tpu.matmul %30, %34, %cst_22 {dimension_numbers = #tpu.dot_dimension_numbers<[1], [1], [0], [0], [0, 0, 1, 0], [], []>} : vector<16x8xf32>, vector<16x8xf32>, vector<16x16xf32> -> vector<16x16xf32>
    %40 = arith.addf %39, %2 : vector<16x16xf32>
    %c32_23 = arith.constant 32 : index
    %c0_24 = arith.constant 0 : index
    %41 = vector.load %arg2[%c32_23, %c0_24] : memref<928x64xf32, #tpu.memory_space<vmem>>, vector<32x8xf32>
    %cst_25 = arith.constant dense<0.000000e+00> : vector<16x8xf32>
    %42 = tpu.matmul %26, %41, %cst_25 {dimension_numbers = #tpu.dot_dimension_numbers<[1], [0], [0], [1], [0, 0, 1, 1], [], []>} : vector<16x32xf32>, vector<32x8xf32>, vector<16x8xf32> -> vector<16x8xf32>
    %c16_26 = arith.constant 16 : index
    %c0_27 = arith.constant 0 : index
    %43 = vector.load %arg3[%c16_26, %c0_27] : memref<464x64xf32, #tpu.memory_space<vmem>>, vector<16x8xf32>
    %44 = arith.addf %42, %43 : vector<16x8xf32>
    %c160 = arith.constant 160 : index
    %c0_28 = arith.constant 0 : index
    %45 = vector.load %arg2[%c160, %c0_28] : memref<928x64xf32, #tpu.memory_space<vmem>>, vector<32x8xf32>
    %cst_29 = arith.constant dense<0.000000e+00> : vector<16x8xf32>
    %46 = tpu.matmul %26, %45, %cst_29 {dimension_numbers = #tpu.dot_dimension_numbers<[1], [0], [0], [1], [0, 0, 1, 1], [], []>} : vector<16x32xf32>, vector<32x8xf32>, vector<16x8xf32> -> vector<16x8xf32>
    %c80 = arith.constant 80 : index
    %c0_30 = arith.constant 0 : index
    %47 = vector.load %arg3[%c80, %c0_30] : memref<464x64xf32, #tpu.memory_space<vmem>>, vector<16x8xf32>
    %48 = arith.addf %46, %47 : vector<16x8xf32>
    %c288 = arith.constant 288 : index
    %c0_31 = arith.constant 0 : index
    %49 = vector.load %arg2[%c288, %c0_31] : memref<928x64xf32, #tpu.memory_space<vmem>>, vector<32x8xf32>
    %cst_32 = arith.constant dense<0.000000e+00> : vector<16x8xf32>
    %50 = tpu.matmul %26, %49, %cst_32 {dimension_numbers = #tpu.dot_dimension_numbers<[1], [0], [0], [1], [0, 0, 1, 1], [], []>} : vector<16x32xf32>, vector<32x8xf32>, vector<16x8xf32> -> vector<16x8xf32>
    %c144 = arith.constant 144 : index
    %c0_33 = arith.constant 0 : index
    %51 = vector.load %arg3[%c144, %c0_33] : memref<464x64xf32, #tpu.memory_space<vmem>>, vector<16x8xf32>
    %52 = arith.addf %50, %51 : vector<16x8xf32>
    %cst_34 = arith.constant dense<0.000000e+00> : vector<16x16xf32>
    %53 = tpu.matmul %44, %48, %cst_34 {dimension_numbers = #tpu.dot_dimension_numbers<[1], [1], [0], [0], [0, 0, 1, 0], [], []>} : vector<16x8xf32>, vector<16x8xf32>, vector<16x16xf32> -> vector<16x16xf32>
    %54 = arith.addf %53, %2 : vector<16x16xf32>
    %c64_35 = arith.constant 64 : index
    %c0_36 = arith.constant 0 : index
    %55 = vector.load %arg2[%c64_35, %c0_36] : memref<928x64xf32, #tpu.memory_space<vmem>>, vector<32x8xf32>
    %cst_37 = arith.constant dense<0.000000e+00> : vector<16x8xf32>
    %56 = tpu.matmul %26, %55, %cst_37 {dimension_numbers = #tpu.dot_dimension_numbers<[1], [0], [0], [1], [0, 0, 1, 1], [], []>} : vector<16x32xf32>, vector<32x8xf32>, vector<16x8xf32> -> vector<16x8xf32>
    %c32_38 = arith.constant 32 : index
    %c0_39 = arith.constant 0 : index
    %57 = vector.load %arg3[%c32_38, %c0_39] : memref<464x64xf32, #tpu.memory_space<vmem>>, vector<16x8xf32>
    %58 = arith.addf %56, %57 : vector<16x8xf32>
    %c192 = arith.constant 192 : index
    %c0_40 = arith.constant 0 : index
    %59 = vector.load %arg2[%c192, %c0_40] : memref<928x64xf32, #tpu.memory_space<vmem>>, vector<32x8xf32>
    %cst_41 = arith.constant dense<0.000000e+00> : vector<16x8xf32>
    %60 = tpu.matmul %26, %59, %cst_41 {dimension_numbers = #tpu.dot_dimension_numbers<[1], [0], [0], [1], [0, 0, 1, 1], [], []>} : vector<16x32xf32>, vector<32x8xf32>, vector<16x8xf32> -> vector<16x8xf32>
    %c96 = arith.constant 96 : index
    %c0_42 = arith.constant 0 : index
    %61 = vector.load %arg3[%c96, %c0_42] : memref<464x64xf32, #tpu.memory_space<vmem>>, vector<16x8xf32>
    %62 = arith.addf %60, %61 : vector<16x8xf32>
    %c320 = arith.constant 320 : index
    %c0_43 = arith.constant 0 : index
    %63 = vector.load %arg2[%c320, %c0_43] : memref<928x64xf32, #tpu.memory_space<vmem>>, vector<32x8xf32>
    %cst_44 = arith.constant dense<0.000000e+00> : vector<16x8xf32>
    %64 = tpu.matmul %26, %63, %cst_44 {dimension_numbers = #tpu.dot_dimension_numbers<[1], [0], [0], [1], [0, 0, 1, 1], [], []>} : vector<16x32xf32>, vector<32x8xf32>, vector<16x8xf32> -> vector<16x8xf32>
    %c160_45 = arith.constant 160 : index
    %c0_46 = arith.constant 0 : index
    %65 = vector.load %arg3[%c160_45, %c0_46] : memref<464x64xf32, #tpu.memory_space<vmem>>, vector<16x8xf32>
    %66 = arith.addf %64, %65 : vector<16x8xf32>
    %cst_47 = arith.constant dense<0.000000e+00> : vector<16x16xf32>
    %67 = tpu.matmul %58, %62, %cst_47 {dimension_numbers = #tpu.dot_dimension_numbers<[1], [1], [0], [0], [0, 0, 1, 0], [], []>} : vector<16x8xf32>, vector<16x8xf32>, vector<16x16xf32> -> vector<16x16xf32>
    %68 = arith.addf %67, %2 : vector<16x16xf32>
    %c96_48 = arith.constant 96 : index
    %c0_49 = arith.constant 0 : index
    %69 = vector.load %arg2[%c96_48, %c0_49] : memref<928x64xf32, #tpu.memory_space<vmem>>, vector<32x8xf32>
    %cst_50 = arith.constant dense<0.000000e+00> : vector<16x8xf32>
    %70 = tpu.matmul %26, %69, %cst_50 {dimension_numbers = #tpu.dot_dimension_numbers<[1], [0], [0], [1], [0, 0, 1, 1], [], []>} : vector<16x32xf32>, vector<32x8xf32>, vector<16x8xf32> -> vector<16x8xf32>
    %c48_51 = arith.constant 48 : index
    %c0_52 = arith.constant 0 : index
    %71 = vector.load %arg3[%c48_51, %c0_52] : memref<464x64xf32, #tpu.memory_space<vmem>>, vector<16x8xf32>
    %72 = arith.addf %70, %71 : vector<16x8xf32>
    %c224 = arith.constant 224 : index
    %c0_53 = arith.constant 0 : index
    %73 = vector.load %arg2[%c224, %c0_53] : memref<928x64xf32, #tpu.memory_space<vmem>>, vector<32x8xf32>
    %cst_54 = arith.constant dense<0.000000e+00> : vector<16x8xf32>
    %74 = tpu.matmul %26, %73, %cst_54 {dimension_numbers = #tpu.dot_dimension_numbers<[1], [0], [0], [1], [0, 0, 1, 1], [], []>} : vector<16x32xf32>, vector<32x8xf32>, vector<16x8xf32> -> vector<16x8xf32>
    %c112 = arith.constant 112 : index
    %c0_55 = arith.constant 0 : index
    %75 = vector.load %arg3[%c112, %c0_55] : memref<464x64xf32, #tpu.memory_space<vmem>>, vector<16x8xf32>
    %76 = arith.addf %74, %75 : vector<16x8xf32>
    %c352 = arith.constant 352 : index
    %c0_56 = arith.constant 0 : index
    %77 = vector.load %arg2[%c352, %c0_56] : memref<928x64xf32, #tpu.memory_space<vmem>>, vector<32x8xf32>
    %cst_57 = arith.constant dense<0.000000e+00> : vector<16x8xf32>
    %78 = tpu.matmul %26, %77, %cst_57 {dimension_numbers = #tpu.dot_dimension_numbers<[1], [0], [0], [1], [0, 0, 1, 1], [], []>} : vector<16x32xf32>, vector<32x8xf32>, vector<16x8xf32> -> vector<16x8xf32>
    %c176 = arith.constant 176 : index
    %c0_58 = arith.constant 0 : index
    %79 = vector.load %arg3[%c176, %c0_58] : memref<464x64xf32, #tpu.memory_space<vmem>>, vector<16x8xf32>
    %80 = arith.addf %78, %79 : vector<16x8xf32>
    %cst_59 = arith.constant dense<0.000000e+00> : vector<16x16xf32>
    %81 = tpu.matmul %72, %76, %cst_59 {dimension_numbers = #tpu.dot_dimension_numbers<[1], [1], [0], [0], [0, 0, 1, 0], [], []>} : vector<16x8xf32>, vector<16x8xf32>, vector<16x16xf32> -> vector<16x16xf32>
    %82 = arith.addf %81, %2 : vector<16x16xf32>
    %83 = tpu.concatenate %40, %54, %68, %82 in 0 : vector<16x16xf32>, vector<16x16xf32>, vector<16x16xf32>, vector<16x16xf32> -> vector<64x16xf32>
    %cst_60 = arith.constant dense<0xFF800000> : vector<64xf32>
    %84 = vector.multi_reduction <maximumf>, %83, %cst_60 [1] : vector<64x16xf32> to vector<64xf32>
    %85 = vector.shape_cast %84 : vector<64xf32> to vector<64x1xf32>
    %86 = vector.broadcast %85 : vector<64x1xf32> to vector<64x16xf32>
    %87 = arith.subf %83, %86 : vector<64x16xf32>
    %88 = math.exp %87 : vector<64x16xf32>
    %cst_61 = arith.constant dense<0.000000e+00> : vector<64xf32>
    %89 = vector.multi_reduction <add>, %88, %cst_61 [1] : vector<64x16xf32> to vector<64xf32>
    %90 = vector.shape_cast %89 : vector<64xf32> to vector<64x1xf32>
    %91 = tpu.reciprocal %90 : vector<64x1xf32> -> vector<64x1xf32>
    %92 = vector.broadcast %91 : vector<64x1xf32> to vector<64x16xf32>
    %93 = arith.mulf %88, %92 : vector<64x16xf32>
    %cst_62 = arith.constant 0.000000e+00 : f32
    %94 = vector.broadcast %cst_62 : f32 to vector<16x32xf32>
    %95 = vector.extract_strided_slice %93 {offsets = [0, 0], sizes = [16, 16], strides = [1, 1]} : vector<64x16xf32> to vector<16x16xf32>
    %cst_63 = arith.constant dense<0.000000e+00> : vector<16x8xf32>
    %96 = tpu.matmul %95, %38, %cst_63 {dimension_numbers = #tpu.dot_dimension_numbers<[1], [0], [0], [1], [0, 0, 1, 1], [], []>} : vector<16x16xf32>, vector<16x8xf32>, vector<16x8xf32> -> vector<16x8xf32>
    %c768 = arith.constant 768 : index
    %c0_64 = arith.constant 0 : index
    %97 = vector.load %arg2[%c768, %c0_64] : memref<928x64xf32, #tpu.memory_space<vmem>>, vector<8x32xf32>
    %cst_65 = arith.constant dense<0.000000e+00> : vector<16x32xf32>
    %98 = tpu.matmul %96, %97, %cst_65 {dimension_numbers = #tpu.dot_dimension_numbers<[1], [0], [0], [1], [0, 0, 1, 1], [], []>} : vector<16x8xf32>, vector<8x32xf32>, vector<16x32xf32> -> vector<16x32xf32>
    %99 = arith.addf %94, %98 : vector<16x32xf32>
    %100 = vector.extract_strided_slice %93 {offsets = [16, 0], sizes = [16, 16], strides = [1, 1]} : vector<64x16xf32> to vector<16x16xf32>
    %cst_66 = arith.constant dense<0.000000e+00> : vector<16x8xf32>
    %101 = tpu.matmul %100, %52, %cst_66 {dimension_numbers = #tpu.dot_dimension_numbers<[1], [0], [0], [1], [0, 0, 1, 1], [], []>} : vector<16x16xf32>, vector<16x8xf32>, vector<16x8xf32> -> vector<16x8xf32>
    %c776 = arith.constant 776 : index
    %c0_67 = arith.constant 0 : index
    %102 = vector.load %arg2[%c776, %c0_67] : memref<928x64xf32, #tpu.memory_space<vmem>>, vector<8x32xf32>
    %cst_68 = arith.constant dense<0.000000e+00> : vector<16x32xf32>
    %103 = tpu.matmul %101, %102, %cst_68 {dimension_numbers = #tpu.dot_dimension_numbers<[1], [0], [0], [1], [0, 0, 1, 1], [], []>} : vector<16x8xf32>, vector<8x32xf32>, vector<16x32xf32> -> vector<16x32xf32>
    %104 = arith.addf %99, %103 : vector<16x32xf32>
    %105 = vector.extract_strided_slice %93 {offsets = [32, 0], sizes = [16, 16], strides = [1, 1]} : vector<64x16xf32> to vector<16x16xf32>
    %cst_69 = arith.constant dense<0.000000e+00> : vector<16x8xf32>
    %106 = tpu.matmul %105, %66, %cst_69 {dimension_numbers = #tpu.dot_dimension_numbers<[1], [0], [0], [1], [0, 0, 1, 1], [], []>} : vector<16x16xf32>, vector<16x8xf32>, vector<16x8xf32> -> vector<16x8xf32>
    %c784 = arith.constant 784 : index
    %c0_70 = arith.constant 0 : index
    %107 = vector.load %arg2[%c784, %c0_70] : memref<928x64xf32, #tpu.memory_space<vmem>>, vector<8x32xf32>
    %cst_71 = arith.constant dense<0.000000e+00> : vector<16x32xf32>
    %108 = tpu.matmul %106, %107, %cst_71 {dimension_numbers = #tpu.dot_dimension_numbers<[1], [0], [0], [1], [0, 0, 1, 1], [], []>} : vector<16x8xf32>, vector<8x32xf32>, vector<16x32xf32> -> vector<16x32xf32>
    %109 = arith.addf %104, %108 : vector<16x32xf32>
    %110 = vector.extract_strided_slice %93 {offsets = [48, 0], sizes = [16, 16], strides = [1, 1]} : vector<64x16xf32> to vector<16x16xf32>
    %cst_72 = arith.constant dense<0.000000e+00> : vector<16x8xf32>
    %111 = tpu.matmul %110, %80, %cst_72 {dimension_numbers = #tpu.dot_dimension_numbers<[1], [0], [0], [1], [0, 0, 1, 1], [], []>} : vector<16x16xf32>, vector<16x8xf32>, vector<16x8xf32> -> vector<16x8xf32>
    %c792 = arith.constant 792 : index
    %c0_73 = arith.constant 0 : index
    %112 = vector.load %arg2[%c792, %c0_73] : memref<928x64xf32, #tpu.memory_space<vmem>>, vector<8x32xf32>
    %cst_74 = arith.constant dense<0.000000e+00> : vector<16x32xf32>
    %113 = tpu.matmul %111, %112, %cst_74 {dimension_numbers = #tpu.dot_dimension_numbers<[1], [0], [0], [1], [0, 0, 1, 1], [], []>} : vector<16x8xf32>, vector<8x32xf32>, vector<16x32xf32> -> vector<16x32xf32>
    %114 = arith.addf %109, %113 : vector<16x32xf32>
    %c384 = arith.constant 384 : index
    %c0_75 = arith.constant 0 : index
    %115 = vector.load %arg3[%c384, %c0_75] : memref<464x64xf32, #tpu.memory_space<vmem>>, vector<1x32xf32>
    %116 = vector.broadcast %115 : vector<1x32xf32> to vector<16x32xf32>
    %117 = arith.addf %114, %116 : vector<16x32xf32>
    %118 = arith.addf %0, %117 : vector<16x32xf32>
    %cst_76 = arith.constant dense<0.000000e+00> : vector<16xf32>
    %119 = vector.multi_reduction <add>, %118, %cst_76 [1] : vector<16x32xf32> to vector<16xf32>
    %120 = vector.shape_cast %119 : vector<16xf32> to vector<16x1xf32>
    %cst_77 = arith.constant 3.200000e+01 : f32
    %121 = vector.broadcast %cst_77 : f32 to vector<16x1xf32>
    %122 = arith.divf %120, %121 : vector<16x1xf32>
    %123 = vector.broadcast %122 : vector<16x1xf32> to vector<16x32xf32>
    %124 = arith.subf %118, %123 : vector<16x32xf32>
    %125 = arith.mulf %124, %124 : vector<16x32xf32>
    %cst_78 = arith.constant dense<0.000000e+00> : vector<16xf32>
    %126 = vector.multi_reduction <add>, %125, %cst_78 [1] : vector<16x32xf32> to vector<16xf32>
    %127 = vector.shape_cast %126 : vector<16xf32> to vector<16x1xf32>
    %cst_79 = arith.constant 0.0322580636 : f32
    %128 = vector.broadcast %cst_79 : f32 to vector<16x1xf32>
    %129 = arith.mulf %127, %128 : vector<16x1xf32>
    %130 = math.sqrt %129 : vector<16x1xf32>
    %c432 = arith.constant 432 : index
    %c0_80 = arith.constant 0 : index
    %131 = vector.load %arg3[%c432, %c0_80] : memref<464x64xf32, #tpu.memory_space<vmem>>, vector<1x32xf32>
    %cst_81 = arith.constant 9.99999997E-7 : f32
    %132 = vector.broadcast %cst_81 : f32 to vector<16x1xf32>
    %133 = arith.addf %130, %132 : vector<16x1xf32>
    %134 = tpu.reciprocal %133 : vector<16x1xf32> -> vector<16x1xf32>
    %135 = vector.broadcast %134 : vector<16x1xf32> to vector<16x32xf32>
    %136 = arith.mulf %124, %135 : vector<16x32xf32>
    %137 = vector.broadcast %131 : vector<1x32xf32> to vector<16x32xf32>
    %138 = arith.mulf %137, %136 : vector<16x32xf32>
    %c440 = arith.constant 440 : index
    %c0_82 = arith.constant 0 : index
    %139 = vector.load %arg3[%c440, %c0_82] : memref<464x64xf32, #tpu.memory_space<vmem>>, vector<1x32xf32>
    %140 = vector.broadcast %139 : vector<1x32xf32> to vector<16x32xf32>
    %141 = arith.addf %138, %140 : vector<16x32xf32>
    %c384_83 = arith.constant 384 : index
    %c0_84 = arith.constant 0 : index
    %142 = vector.load %arg2[%c384_83, %c0_84] : memref<928x64xf32, #tpu.memory_space<vmem>>, vector<32x8xf32>
    %cst_85 = arith.constant dense<0.000000e+00> : vector<16x8xf32>
    %143 = tpu.matmul %141, %142, %cst_85 {dimension_numbers = #tpu.dot_dimension_numbers<[1], [0], [0], [1], [0, 0, 1, 1], [], []>} : vector<16x32xf32>, vector<32x8xf32>, vector<16x8xf32> -> vector<16x8xf32>
    %c192_86 = arith.constant 192 : index
    %c0_87 = arith.constant 0 : index
    %144 = vector.load %arg3[%c192_86, %c0_87] : memref<464x64xf32, #tpu.memory_space<vmem>>, vector<16x8xf32>
    %145 = arith.addf %143, %144 : vector<16x8xf32>
    %c512 = arith.constant 512 : index
    %c0_88 = arith.constant 0 : index
    %146 = vector.load %arg2[%c512, %c0_88] : memref<928x64xf32, #tpu.memory_space<vmem>>, vector<32x8xf32>
    %cst_89 = arith.constant dense<0.000000e+00> : vector<16x8xf32>
    %147 = tpu.matmul %1, %146, %cst_89 {dimension_numbers = #tpu.dot_dimension_numbers<[1], [0], [0], [1], [0, 0, 1, 1], [], []>} : vector<16x32xf32>, vector<32x8xf32>, vector<16x8xf32> -> vector<16x8xf32>
    %c256_90 = arith.constant 256 : index
    %c0_91 = arith.constant 0 : index
    %148 = vector.load %arg3[%c256_90, %c0_91] : memref<464x64xf32, #tpu.memory_space<vmem>>, vector<16x8xf32>
    %149 = arith.addf %147, %148 : vector<16x8xf32>
    %c640 = arith.constant 640 : index
    %c0_92 = arith.constant 0 : index
    %150 = vector.load %arg2[%c640, %c0_92] : memref<928x64xf32, #tpu.memory_space<vmem>>, vector<32x8xf32>
    %cst_93 = arith.constant dense<0.000000e+00> : vector<16x8xf32>
    %151 = tpu.matmul %1, %150, %cst_93 {dimension_numbers = #tpu.dot_dimension_numbers<[1], [0], [0], [1], [0, 0, 1, 1], [], []>} : vector<16x32xf32>, vector<32x8xf32>, vector<16x8xf32> -> vector<16x8xf32>
    %c320_94 = arith.constant 320 : index
    %c0_95 = arith.constant 0 : index
    %152 = vector.load %arg3[%c320_94, %c0_95] : memref<464x64xf32, #tpu.memory_space<vmem>>, vector<16x8xf32>
    %153 = arith.addf %151, %152 : vector<16x8xf32>
    %cst_96 = arith.constant dense<0.000000e+00> : vector<16x16xf32>
    %154 = tpu.matmul %145, %149, %cst_96 {dimension_numbers = #tpu.dot_dimension_numbers<[1], [1], [0], [0], [0, 0, 1, 0], [], []>} : vector<16x8xf32>, vector<16x8xf32>, vector<16x16xf32> -> vector<16x16xf32>
    %155 = arith.addf %154, %3 : vector<16x16xf32>
    %c416_97 = arith.constant 416 : index
    %c0_98 = arith.constant 0 : index
    %156 = vector.load %arg2[%c416_97, %c0_98] : memref<928x64xf32, #tpu.memory_space<vmem>>, vector<32x8xf32>
    %cst_99 = arith.constant dense<0.000000e+00> : vector<16x8xf32>
    %157 = tpu.matmul %141, %156, %cst_99 {dimension_numbers = #tpu.dot_dimension_numbers<[1], [0], [0], [1], [0, 0, 1, 1], [], []>} : vector<16x32xf32>, vector<32x8xf32>, vector<16x8xf32> -> vector<16x8xf32>
    %c208 = arith.constant 208 : index
    %c0_100 = arith.constant 0 : index
    %158 = vector.load %arg3[%c208, %c0_100] : memref<464x64xf32, #tpu.memory_space<vmem>>, vector<16x8xf32>
    %159 = arith.addf %157, %158 : vector<16x8xf32>
    %c544 = arith.constant 544 : index
    %c0_101 = arith.constant 0 : index
    %160 = vector.load %arg2[%c544, %c0_101] : memref<928x64xf32, #tpu.memory_space<vmem>>, vector<32x8xf32>
    %cst_102 = arith.constant dense<0.000000e+00> : vector<16x8xf32>
    %161 = tpu.matmul %1, %160, %cst_102 {dimension_numbers = #tpu.dot_dimension_numbers<[1], [0], [0], [1], [0, 0, 1, 1], [], []>} : vector<16x32xf32>, vector<32x8xf32>, vector<16x8xf32> -> vector<16x8xf32>
    %c272 = arith.constant 272 : index
    %c0_103 = arith.constant 0 : index
    %162 = vector.load %arg3[%c272, %c0_103] : memref<464x64xf32, #tpu.memory_space<vmem>>, vector<16x8xf32>
    %163 = arith.addf %161, %162 : vector<16x8xf32>
    %c672 = arith.constant 672 : index
    %c0_104 = arith.constant 0 : index
    %164 = vector.load %arg2[%c672, %c0_104] : memref<928x64xf32, #tpu.memory_space<vmem>>, vector<32x8xf32>
    %cst_105 = arith.constant dense<0.000000e+00> : vector<16x8xf32>
    %165 = tpu.matmul %1, %164, %cst_105 {dimension_numbers = #tpu.dot_dimension_numbers<[1], [0], [0], [1], [0, 0, 1, 1], [], []>} : vector<16x32xf32>, vector<32x8xf32>, vector<16x8xf32> -> vector<16x8xf32>
    %c336 = arith.constant 336 : index
    %c0_106 = arith.constant 0 : index
    %166 = vector.load %arg3[%c336, %c0_106] : memref<464x64xf32, #tpu.memory_space<vmem>>, vector<16x8xf32>
    %167 = arith.addf %165, %166 : vector<16x8xf32>
    %cst_107 = arith.constant dense<0.000000e+00> : vector<16x16xf32>
    %168 = tpu.matmul %159, %163, %cst_107 {dimension_numbers = #tpu.dot_dimension_numbers<[1], [1], [0], [0], [0, 0, 1, 0], [], []>} : vector<16x8xf32>, vector<16x8xf32>, vector<16x16xf32> -> vector<16x16xf32>
    %169 = arith.addf %168, %3 : vector<16x16xf32>
    %c448 = arith.constant 448 : index
    %c0_108 = arith.constant 0 : index
    %170 = vector.load %arg2[%c448, %c0_108] : memref<928x64xf32, #tpu.memory_space<vmem>>, vector<32x8xf32>
    %cst_109 = arith.constant dense<0.000000e+00> : vector<16x8xf32>
    %171 = tpu.matmul %141, %170, %cst_109 {dimension_numbers = #tpu.dot_dimension_numbers<[1], [0], [0], [1], [0, 0, 1, 1], [], []>} : vector<16x32xf32>, vector<32x8xf32>, vector<16x8xf32> -> vector<16x8xf32>
    %c224_110 = arith.constant 224 : index
    %c0_111 = arith.constant 0 : index
    %172 = vector.load %arg3[%c224_110, %c0_111] : memref<464x64xf32, #tpu.memory_space<vmem>>, vector<16x8xf32>
    %173 = arith.addf %171, %172 : vector<16x8xf32>
    %c576 = arith.constant 576 : index
    %c0_112 = arith.constant 0 : index
    %174 = vector.load %arg2[%c576, %c0_112] : memref<928x64xf32, #tpu.memory_space<vmem>>, vector<32x8xf32>
    %cst_113 = arith.constant dense<0.000000e+00> : vector<16x8xf32>
    %175 = tpu.matmul %1, %174, %cst_113 {dimension_numbers = #tpu.dot_dimension_numbers<[1], [0], [0], [1], [0, 0, 1, 1], [], []>} : vector<16x32xf32>, vector<32x8xf32>, vector<16x8xf32> -> vector<16x8xf32>
    %c288_114 = arith.constant 288 : index
    %c0_115 = arith.constant 0 : index
    %176 = vector.load %arg3[%c288_114, %c0_115] : memref<464x64xf32, #tpu.memory_space<vmem>>, vector<16x8xf32>
    %177 = arith.addf %175, %176 : vector<16x8xf32>
    %c704 = arith.constant 704 : index
    %c0_116 = arith.constant 0 : index
    %178 = vector.load %arg2[%c704, %c0_116] : memref<928x64xf32, #tpu.memory_space<vmem>>, vector<32x8xf32>
    %cst_117 = arith.constant dense<0.000000e+00> : vector<16x8xf32>
    %179 = tpu.matmul %1, %178, %cst_117 {dimension_numbers = #tpu.dot_dimension_numbers<[1], [0], [0], [1], [0, 0, 1, 1], [], []>} : vector<16x32xf32>, vector<32x8xf32>, vector<16x8xf32> -> vector<16x8xf32>
    %c352_118 = arith.constant 352 : index
    %c0_119 = arith.constant 0 : index
    %180 = vector.load %arg3[%c352_118, %c0_119] : memref<464x64xf32, #tpu.memory_space<vmem>>, vector<16x8xf32>
    %181 = arith.addf %179, %180 : vector<16x8xf32>
    %cst_120 = arith.constant dense<0.000000e+00> : vector<16x16xf32>
    %182 = tpu.matmul %173, %177, %cst_120 {dimension_numbers = #tpu.dot_dimension_numbers<[1], [1], [0], [0], [0, 0, 1, 0], [], []>} : vector<16x8xf32>, vector<16x8xf32>, vector<16x16xf32> -> vector<16x16xf32>
    %183 = arith.addf %182, %3 : vector<16x16xf32>
    %c480 = arith.constant 480 : index
    %c0_121 = arith.constant 0 : index
    %184 = vector.load %arg2[%c480, %c0_121] : memref<928x64xf32, #tpu.memory_space<vmem>>, vector<32x8xf32>
    %cst_122 = arith.constant dense<0.000000e+00> : vector<16x8xf32>
    %185 = tpu.matmul %141, %184, %cst_122 {dimension_numbers = #tpu.dot_dimension_numbers<[1], [0], [0], [1], [0, 0, 1, 1], [], []>} : vector<16x32xf32>, vector<32x8xf32>, vector<16x8xf32> -> vector<16x8xf32>
    %c240 = arith.constant 240 : index
    %c0_123 = arith.constant 0 : index
    %186 = vector.load %arg3[%c240, %c0_123] : memref<464x64xf32, #tpu.memory_space<vmem>>, vector<16x8xf32>
    %187 = arith.addf %185, %186 : vector<16x8xf32>
    %c608 = arith.constant 608 : index
    %c0_124 = arith.constant 0 : index
    %188 = vector.load %arg2[%c608, %c0_124] : memref<928x64xf32, #tpu.memory_space<vmem>>, vector<32x8xf32>
    %cst_125 = arith.constant dense<0.000000e+00> : vector<16x8xf32>
    %189 = tpu.matmul %1, %188, %cst_125 {dimension_numbers = #tpu.dot_dimension_numbers<[1], [0], [0], [1], [0, 0, 1, 1], [], []>} : vector<16x32xf32>, vector<32x8xf32>, vector<16x8xf32> -> vector<16x8xf32>
    %c304 = arith.constant 304 : index
    %c0_126 = arith.constant 0 : index
    %190 = vector.load %arg3[%c304, %c0_126] : memref<464x64xf32, #tpu.memory_space<vmem>>, vector<16x8xf32>
    %191 = arith.addf %189, %190 : vector<16x8xf32>
    %c736 = arith.constant 736 : index
    %c0_127 = arith.constant 0 : index
    %192 = vector.load %arg2[%c736, %c0_127] : memref<928x64xf32, #tpu.memory_space<vmem>>, vector<32x8xf32>
    %cst_128 = arith.constant dense<0.000000e+00> : vector<16x8xf32>
    %193 = tpu.matmul %1, %192, %cst_128 {dimension_numbers = #tpu.dot_dimension_numbers<[1], [0], [0], [1], [0, 0, 1, 1], [], []>} : vector<16x32xf32>, vector<32x8xf32>, vector<16x8xf32> -> vector<16x8xf32>
    %c368 = arith.constant 368 : index
    %c0_129 = arith.constant 0 : index
    %194 = vector.load %arg3[%c368, %c0_129] : memref<464x64xf32, #tpu.memory_space<vmem>>, vector<16x8xf32>
    %195 = arith.addf %193, %194 : vector<16x8xf32>
    %cst_130 = arith.constant dense<0.000000e+00> : vector<16x16xf32>
    %196 = tpu.matmul %187, %191, %cst_130 {dimension_numbers = #tpu.dot_dimension_numbers<[1], [1], [0], [0], [0, 0, 1, 0], [], []>} : vector<16x8xf32>, vector<16x8xf32>, vector<16x16xf32> -> vector<16x16xf32>
    %197 = arith.addf %196, %3 : vector<16x16xf32>
    %198 = tpu.concatenate %155, %169, %183, %197 in 0 : vector<16x16xf32>, vector<16x16xf32>, vector<16x16xf32>, vector<16x16xf32> -> vector<64x16xf32>
    %cst_131 = arith.constant dense<0xFF800000> : vector<64xf32>
    %199 = vector.multi_reduction <maximumf>, %198, %cst_131 [1] : vector<64x16xf32> to vector<64xf32>
    %200 = vector.shape_cast %199 : vector<64xf32> to vector<64x1xf32>
    %201 = vector.broadcast %200 : vector<64x1xf32> to vector<64x16xf32>
    %202 = arith.subf %198, %201 : vector<64x16xf32>
    %203 = math.exp %202 : vector<64x16xf32>
    %cst_132 = arith.constant dense<0.000000e+00> : vector<64xf32>
    %204 = vector.multi_reduction <add>, %203, %cst_132 [1] : vector<64x16xf32> to vector<64xf32>
    %205 = vector.shape_cast %204 : vector<64xf32> to vector<64x1xf32>
    %206 = tpu.reciprocal %205 : vector<64x1xf32> -> vector<64x1xf32>
    %207 = vector.broadcast %206 : vector<64x1xf32> to vector<64x16xf32>
    %208 = arith.mulf %203, %207 : vector<64x16xf32>
    %cst_133 = arith.constant 0.000000e+00 : f32
    %209 = vector.broadcast %cst_133 : f32 to vector<16x32xf32>
    %210 = vector.extract_strided_slice %208 {offsets = [0, 0], sizes = [16, 16], strides = [1, 1]} : vector<64x16xf32> to vector<16x16xf32>
    %cst_134 = arith.constant dense<0.000000e+00> : vector<16x8xf32>
    %211 = tpu.matmul %210, %153, %cst_134 {dimension_numbers = #tpu.dot_dimension_numbers<[1], [0], [0], [1], [0, 0, 1, 1], [], []>} : vector<16x16xf32>, vector<16x8xf32>, vector<16x8xf32> -> vector<16x8xf32>
    %c800 = arith.constant 800 : index
    %c0_135 = arith.constant 0 : index
    %212 = vector.load %arg2[%c800, %c0_135] : memref<928x64xf32, #tpu.memory_space<vmem>>, vector<8x32xf32>
    %cst_136 = arith.constant dense<0.000000e+00> : vector<16x32xf32>
    %213 = tpu.matmul %211, %212, %cst_136 {dimension_numbers = #tpu.dot_dimension_numbers<[1], [0], [0], [1], [0, 0, 1, 1], [], []>} : vector<16x8xf32>, vector<8x32xf32>, vector<16x32xf32> -> vector<16x32xf32>
    %214 = arith.addf %209, %213 : vector<16x32xf32>
    %215 = vector.extract_strided_slice %208 {offsets = [16, 0], sizes = [16, 16], strides = [1, 1]} : vector<64x16xf32> to vector<16x16xf32>
    %cst_137 = arith.constant dense<0.000000e+00> : vector<16x8xf32>
    %216 = tpu.matmul %215, %167, %cst_137 {dimension_numbers = #tpu.dot_dimension_numbers<[1], [0], [0], [1], [0, 0, 1, 1], [], []>} : vector<16x16xf32>, vector<16x8xf32>, vector<16x8xf32> -> vector<16x8xf32>
    %c808 = arith.constant 808 : index
    %c0_138 = arith.constant 0 : index
    %217 = vector.load %arg2[%c808, %c0_138] : memref<928x64xf32, #tpu.memory_space<vmem>>, vector<8x32xf32>
    %cst_139 = arith.constant dense<0.000000e+00> : vector<16x32xf32>
    %218 = tpu.matmul %216, %217, %cst_139 {dimension_numbers = #tpu.dot_dimension_numbers<[1], [0], [0], [1], [0, 0, 1, 1], [], []>} : vector<16x8xf32>, vector<8x32xf32>, vector<16x32xf32> -> vector<16x32xf32>
    %219 = arith.addf %214, %218 : vector<16x32xf32>
    %220 = vector.extract_strided_slice %208 {offsets = [32, 0], sizes = [16, 16], strides = [1, 1]} : vector<64x16xf32> to vector<16x16xf32>
    %cst_140 = arith.constant dense<0.000000e+00> : vector<16x8xf32>
    %221 = tpu.matmul %220, %181, %cst_140 {dimension_numbers = #tpu.dot_dimension_numbers<[1], [0], [0], [1], [0, 0, 1, 1], [], []>} : vector<16x16xf32>, vector<16x8xf32>, vector<16x8xf32> -> vector<16x8xf32>
    %c816 = arith.constant 816 : index
    %c0_141 = arith.constant 0 : index
    %222 = vector.load %arg2[%c816, %c0_141] : memref<928x64xf32, #tpu.memory_space<vmem>>, vector<8x32xf32>
    %cst_142 = arith.constant dense<0.000000e+00> : vector<16x32xf32>
    %223 = tpu.matmul %221, %222, %cst_142 {dimension_numbers = #tpu.dot_dimension_numbers<[1], [0], [0], [1], [0, 0, 1, 1], [], []>} : vector<16x8xf32>, vector<8x32xf32>, vector<16x32xf32> -> vector<16x32xf32>
    %224 = arith.addf %219, %223 : vector<16x32xf32>
    %225 = vector.extract_strided_slice %208 {offsets = [48, 0], sizes = [16, 16], strides = [1, 1]} : vector<64x16xf32> to vector<16x16xf32>
    %cst_143 = arith.constant dense<0.000000e+00> : vector<16x8xf32>
    %226 = tpu.matmul %225, %195, %cst_143 {dimension_numbers = #tpu.dot_dimension_numbers<[1], [0], [0], [1], [0, 0, 1, 1], [], []>} : vector<16x16xf32>, vector<16x8xf32>, vector<16x8xf32> -> vector<16x8xf32>
    %c824 = arith.constant 824 : index
    %c0_144 = arith.constant 0 : index
    %227 = vector.load %arg2[%c824, %c0_144] : memref<928x64xf32, #tpu.memory_space<vmem>>, vector<8x32xf32>
    %cst_145 = arith.constant dense<0.000000e+00> : vector<16x32xf32>
    %228 = tpu.matmul %226, %227, %cst_145 {dimension_numbers = #tpu.dot_dimension_numbers<[1], [0], [0], [1], [0, 0, 1, 1], [], []>} : vector<16x8xf32>, vector<8x32xf32>, vector<16x32xf32> -> vector<16x32xf32>
    %229 = arith.addf %224, %228 : vector<16x32xf32>
    %c392 = arith.constant 392 : index
    %c0_146 = arith.constant 0 : index
    %230 = vector.load %arg3[%c392, %c0_146] : memref<464x64xf32, #tpu.memory_space<vmem>>, vector<1x32xf32>
    %231 = vector.broadcast %230 : vector<1x32xf32> to vector<16x32xf32>
    %232 = arith.addf %229, %231 : vector<16x32xf32>
    %233 = arith.addf %118, %232 : vector<16x32xf32>
    %cst_147 = arith.constant dense<0.000000e+00> : vector<16xf32>
    %234 = vector.multi_reduction <add>, %233, %cst_147 [1] : vector<16x32xf32> to vector<16xf32>
    %235 = vector.shape_cast %234 : vector<16xf32> to vector<16x1xf32>
    %cst_148 = arith.constant 3.200000e+01 : f32
    %236 = vector.broadcast %cst_148 : f32 to vector<16x1xf32>
    %237 = arith.divf %235, %236 : vector<16x1xf32>
    %238 = vector.broadcast %237 : vector<16x1xf32> to vector<16x32xf32>
    %239 = arith.subf %233, %238 : vector<16x32xf32>
    %240 = arith.mulf %239, %239 : vector<16x32xf32>
    %cst_149 = arith.constant dense<0.000000e+00> : vector<16xf32>
    %241 = vector.multi_reduction <add>, %240, %cst_149 [1] : vector<16x32xf32> to vector<16xf32>
    %242 = vector.shape_cast %241 : vector<16xf32> to vector<16x1xf32>
    %cst_150 = arith.constant 0.0322580636 : f32
    %243 = vector.broadcast %cst_150 : f32 to vector<16x1xf32>
    %244 = arith.mulf %242, %243 : vector<16x1xf32>
    %245 = math.sqrt %244 : vector<16x1xf32>
    %c448_151 = arith.constant 448 : index
    %c0_152 = arith.constant 0 : index
    %246 = vector.load %arg3[%c448_151, %c0_152] : memref<464x64xf32, #tpu.memory_space<vmem>>, vector<1x32xf32>
    %cst_153 = arith.constant 9.99999997E-7 : f32
    %247 = vector.broadcast %cst_153 : f32 to vector<16x1xf32>
    %248 = arith.addf %245, %247 : vector<16x1xf32>
    %249 = tpu.reciprocal %248 : vector<16x1xf32> -> vector<16x1xf32>
    %250 = vector.broadcast %249 : vector<16x1xf32> to vector<16x32xf32>
    %251 = arith.mulf %239, %250 : vector<16x32xf32>
    %252 = vector.broadcast %246 : vector<1x32xf32> to vector<16x32xf32>
    %253 = arith.mulf %252, %251 : vector<16x32xf32>
    %c456 = arith.constant 456 : index
    %c0_154 = arith.constant 0 : index
    %254 = vector.load %arg3[%c456, %c0_154] : memref<464x64xf32, #tpu.memory_space<vmem>>, vector<1x32xf32>
    %255 = vector.broadcast %254 : vector<1x32xf32> to vector<16x32xf32>
    %256 = arith.addf %253, %255 : vector<16x32xf32>
    %c832 = arith.constant 832 : index
    %c0_155 = arith.constant 0 : index
    %257 = vector.load %arg2[%c832, %c0_155] : memref<928x64xf32, #tpu.memory_space<vmem>>, vector<32x64xf32>
    %cst_156 = arith.constant dense<0.000000e+00> : vector<16x64xf32>
    %258 = tpu.matmul %256, %257, %cst_156 {dimension_numbers = #tpu.dot_dimension_numbers<[1], [0], [0], [1], [0, 0, 1, 1], [], []>} : vector<16x32xf32>, vector<32x64xf32>, vector<16x64xf32> -> vector<16x64xf32>
    %c400 = arith.constant 400 : index
    %c0_157 = arith.constant 0 : index
    %259 = vector.load %arg3[%c400, %c0_157] : memref<464x64xf32, #tpu.memory_space<vmem>>, vector<1x64xf32>
    %260 = vector.broadcast %259 : vector<1x64xf32> to vector<16x64xf32>
    %261 = arith.addf %258, %260 : vector<16x64xf32>
    %cst_158 = arith.constant 0.000000e+00 : f32
    %262 = vector.broadcast %cst_158 : f32 to vector<16x64xf32>
    %263 = arith.maximumf %261, %262 : vector<16x64xf32>
    %c864 = arith.constant 864 : index
    %c0_159 = arith.constant 0 : index
    %264 = vector.load %arg2[%c864, %c0_159] : memref<928x64xf32, #tpu.memory_space<vmem>>, vector<64x32xf32>
    %cst_160 = arith.constant dense<0.000000e+00> : vector<16x32xf32>
    %265 = tpu.matmul %263, %264, %cst_160 {dimension_numbers = #tpu.dot_dimension_numbers<[1], [0], [0], [1], [0, 0, 1, 1], [], []>} : vector<16x64xf32>, vector<64x32xf32>, vector<16x32xf32> -> vector<16x32xf32>
    %266 = arith.addf %233, %265 : vector<16x32xf32>
    %c408 = arith.constant 408 : index
    %c0_161 = arith.constant 0 : index
    %267 = vector.load %arg3[%c408, %c0_161] : memref<464x64xf32, #tpu.memory_space<vmem>>, vector<1x32xf32>
    %268 = vector.broadcast %267 : vector<1x32xf32> to vector<16x32xf32>
    %269 = arith.addf %266, %268 : vector<16x32xf32>
    %c0_162 = arith.constant 0 : index
    %c0_163 = arith.constant 0 : index
    %270 = vector.load %arg4[%c0_162, %c0_163] : memref<16x32xf32, #tpu.memory_space<vmem>>, vector<16x32xf32>
    tpu.vector_store %arg4[%c0_162, %c0_163], %269 {strides = array<i32>} : memref<16x32xf32, #tpu.memory_space<vmem>>, vector<16x32xf32>,
    return
  }
  func.func @transform_0(%arg0: i32) -> (i32, i32) {
    %c0_i32 = arith.constant 0 : i32
    %c0_i32_0 = arith.constant 0 : i32
    %c0_i32_1 = arith.constant 0 : i32
    return %c0_i32, %c0_i32_0 : i32, i32
  }
  func.func @transform_1(%arg0: i32) -> (i32, i32) {
    %c0_i32 = arith.constant 0 : i32
    %c0_i32_0 = arith.constant 0 : i32
    %c0_i32_1 = arith.constant 0 : i32
    return %c0_i32, %c0_i32_0 : i32, i32
  }
  func.func @transform_2(%arg0: i32) -> (i32, i32) {
    %c0_i32 = arith.constant 0 : i32
    %c0_i32_0 = arith.constant 0 : i32
    %c0_i32_1 = arith.constant 0 : i32
    return %c0_i32, %c0_i32_0 : i32, i32
  }
  func.func @transform_3(%arg0: i32) -> (i32, i32) {
    %c0_i32 = arith.constant 0 : i32
    %c0_i32_0 = arith.constant 0 : i32
    %c0_i32_1 = arith.constant 0 : i32
    return %c0_i32, %c0_i32_0 : i32, i32
  }
}

</mosaic_0001>

<bundles_post_ra>
// kernel: decoder_block_pallas.1
= control target key start
LH: loop header
LB: loop body
LE: loop exit
PB: predicated region body
PF: predicated region fallthrough
CT: control target
= control target key end

     0   :  { %vm23_vm0 = vcmask 261120   ;;  %s6412_s0 = inlined_call_operand.vmem [shape: f32[64,32], index: 0, kind: input, shape index: {}]   ;;  %s6413_s1 = inlined_call_operand.vmem [shape: f32[928,64], index: 1, kind: input, shape index: {}]   ;;  %s6414_s2 = inlined_call_operand.vmem [shape: f32[464,64], index: 2, kind: input, shape index: {}]   ;;  %s6415_s3 = inlined_call_operand.hbm [shape: f32[16,32], index: 3, kind: output, shape index: {}]  }
   0x1   :  { %v15_v0 = vld [vmem:[%s6412_s0] sm:$0xff]  ;;  %v5525_v1 = vld [vmem:[%s6412_s0 + $0x8] sm:$0xff] }
   0x2   :  { %8 = vsyncpa [#allocation3], 0  ;;  %v24_v2 = vsel %vm23_vm0, %v15_v0, 0.0  ;;  %v27_v3 = vsel %vm23_vm0, %v5525_v1, 0.0  ;;  %v82_v14 = vld [vmem:[%s6413_s1 + $0x18] sm:$0xff]  ;;  %v81_v16 = vld [vmem:[%s6413_s1 + $0x10] sm:$0xff] }
   0x3   :  { %25 = vadd.xlane.f32.xlu0 %v24_v2  ;;  %4936 = vmatprep.subr.mxu0 %v82_v14  ;;  %v169_v15 = vld [vmem:[%s6413_s1 + $0x98] sm:$0xff]  ;;  %v168_v17 = vld [vmem:[%s6413_s1 + $0x90] sm:$0xff]  ;;  %v80_v18 = vld [vmem:[%s6413_s1 + $0x8] sm:$0xff]  ;;  %vm328_vm5 = vcmask 64512   ;;  %vm1406_vm6 = vcmask 130048   ;;  %vm4453_vm15 = vcmask 523264  }
   0x4   :  { %4937 = vmatpush3.msra.mxu0 %v82_v14  ;;  %4947 = vmatprep.subr.mxu1 %v169_v15  ;;  %v167_v19 = vld [vmem:[%s6413_s1 + $0x88] sm:$0xff]  ;;  %v79_v20 = vld [vmem:[%s6413_s1] sm:$0xff]  ;;  %v250_v22 = vld [vmem:[%s6413_s1 + $0x118] sm:$0xff] }
   0x5   :  { %4938 = vmatprep.subr.mxu0 %v81_v16  ;;  %4948 = vmatpush3.msra.mxu1 %v169_v15  ;;  %v166_v21 = vld [vmem:[%s6413_s1 + $0x80] sm:$0xff]  ;;  %v4563_v42 = vld [vmem:[%s6414_s2 + $0x1a8] ss:$0 sm:$0xff]  ;;  %v249_v49 = vld [vmem:[%s6413_s1 + $0x110] sm:$0xff] }
   0x6   :  { %4939 = vmatpush3.msra.mxu0 %v81_v16  ;;  %4949 = vmatprep.subr.mxu1 %v168_v17  ;;  %v4562_v40 = vld [vmem:[%s6414_s2 + $0x1a0] ss:$0 sm:$0xff]  ;;  %v248_v50 = vld [vmem:[%s6413_s1 + $0x108] sm:$0xff]  ;;  %v419_v52 = vld [vmem:[%s6413_s1 + $0x38] sm:$0xff] }
   0x7   :  { %28 = vadd.xlane.f32.xlu0 %v27_v3  ;;  %4940 = vmatprep.subr.mxu0 %v80_v18  ;;  %v247_v51 = vld [vmem:[%s6413_s1 + $0x100] sm:$0xff]  ;;  %v418_v53 = vld [vmem:[%s6413_s1 + $0x30] sm:$0xff]  ;;  %v417_v54 = vld [vmem:[%s6413_s1 + $0x28] sm:$0xff] }
   0x8   :  { %4950 = vmatpush3.msra.mxu1 %v168_v17  ;;  %4941 = vmatpush3.msra.mxu0 %v80_v18  ;;  %v416_v55 = vld [vmem:[%s6413_s1 + $0x20] sm:$0xff]  ;;  %v581_v56 = vld [vmem:[%s6413_s1 + $0x138] sm:$0xff]  ;;  %v580_v57 = vld [vmem:[%s6413_s1 + $0x130] sm:$0xff] }
   0x9   :  { %4951 = vmatprep.subr.mxu1 %v167_v19  ;;  %4942 = vmatprep.subr.mxu0 %v79_v20  ;;  %v579_v58 = vld [vmem:[%s6413_s1 + $0x128] sm:$0xff]  ;;  %v578_v59 = vld [vmem:[%s6413_s1 + $0x120] sm:$0xff]  ;;  %v749_v60 = vld [vmem:[%s6413_s1 + $0x58] sm:$0xff] }
   0xa   :  { %4952 = vmatpush3.msra.mxu1 %v167_v19  ;;  %4943 = vmatpush3.msra.mxu0 %v79_v20  ;;  %v748_v61 = vld [vmem:[%s6413_s1 + $0x50] sm:$0xff]  ;;  %v747_v62 = vld [vmem:[%s6413_s1 + $0x48] sm:$0xff]  ;;  %v746_v63 = vld [vmem:[%s6413_s1 + $0x40] sm:$0xff] }
   0xb   :  { %4953 = vmatprep.subr.mxu1 %v166_v21  ;;  %4958 = vmatprep.subr.mxu0 %v250_v22  ;;  %v910_v2 = vld [vmem:[%s6413_s1 + $0x150] sm:$0xff]  ;;  %v909_v3 = vld [vmem:[%s6413_s1 + $0x148] sm:$0xff]  ;;  %v83_v16 = vld [vmem:[%s6414_s2] sm:$0xff] }
   0xc   :  { %4954 = vmatpush3.msra.mxu1 %v166_v21  ;;  %v170_v17 = vld [vmem:[%s6414_s2 + $0x40] sm:$0xff] }
  0x8c   :  { %v26_v4 = vpop.xlane.xlu0 %25 }
  0x8d   :  { %v31_v5 = vmul.f32 0.03125, %v26_v4  ;;  %v908_v4 = vld [vmem:[%s6413_s1 + $0x140] sm:$0xff] }
  0x8f   :  { %v33_v6 = vsub.f32 %v15_v0, %v31_v5  ;;  %v911_v0 = vld [vmem:[%s6413_s1 + $0x158] sm:$0xff] }
  0x90   :  { %v29_v7 = vpop.xlane.xlu0 %28  ;;  %v1079_v5 = vld [vmem:[%s6413_s1 + $0x78] sm:$0xff] }
  0x91   :  { %v32_v8 = vmul.f32 0.03125, %v29_v7  ;;  %v35_v9 = vmul.f32 %v33_v6, %v33_v6  ;;  %v1077_v7 = vld [vmem:[%s6413_s1 + $0x68] sm:$0xff] }
  0x93   :  { %v5531_v10 = vsub.f32 %v5525_v1, %v32_v8  ;;  %v37_v11 = vsel %vm23_vm0, %v35_v9, 0.0  ;;  %v1076_v8 = vld [vmem:[%s6413_s1 + $0x60] sm:$0xff]  ;;  %v1241_v9 = vld [vmem:[%s6413_s1 + $0x178] sm:$0xff] }
  0x94   :  { %38 = vadd.xlane.f32.xlu1 %v37_v11  ;;  %v1239_v11 = vld [vmem:[%s6413_s1 + $0x168] sm:$0xff] }
  0x95   :  { %v36_v12 = vmul.f32 %v5531_v10, %v5531_v10 }
  0x97   :  { %v40_v13 = vsel %vm23_vm0, %v36_v12, 0.0  ;;  %v1238_v12 = vld [vmem:[%s6413_s1 + $0x160] sm:$0xff] }
  0x98   :  { %41 = vadd.xlane.f32.xlu1 %v40_v13  ;;  %v171_v13 = vld [vmem:[%s6414_s2 + $0x48] sm:$0xff] }
 0x11d   :  { %v39_v23 = vpop.xlane.xlu1 %38 }
 0x11e   :  { %v43_v24 = vmul.f32 0.032258064, %v39_v23  ;;  %v84_v23 = vld [vmem:[%s6414_s2 + $0x8] sm:$0xff] }
 0x120   :  { %5385 = vrsqrt.f32 %v43_v24  ;;  %vm47_vm1 = vcmp.eq.f32.partialorder %v43_v24, inf  ;;  %v50_v29 = vand.u32 2147483648, %v43_v24  ;;  %vm49_vm2 = vcmp.eq.f32.partialorder %v43_v24, 0.0 }
 0x121   :  { %v42_v25 = vpop.xlane.xlu1 %41 }
 0x122   :  { %v44_v26 = vmul.f32 0.032258064, %v42_v25  ;;  %v500_v25 = vld [vmem:[%s6413_s1 + $0xb8] sm:$0xff] }
 0x124   :  { %5387 = vrsqrt.f32 %v44_v26  ;;  %vm54_vm3 = vcmp.eq.f32.partialorder %v44_v26, inf  ;;  %v57_v35 = vand.u32 2147483648, %v44_v26  ;;  %vm56_vm4 = vcmp.eq.f32.partialorder %v44_v26, 0.0 }
 0x12d   :  { %v5386_v27 = vpop.eup %5385 }
 0x12e   :  { %v46_v28 = vmul.f32 %v5386_v27, %v43_v24  ;;  %v251_v27 = vld [vmem:[%s6414_s2 + $0x80] sm:$0xff] }
 0x130   :  { %v48_v30 = vsel %vm47_vm1, %v43_v24, %v46_v28  ;;  %v252_v24 = vld [vmem:[%s6414_s2 + $0x88] sm:$0xff] }
 0x131   :  { %v5388_v31 = vpop.eup %5387  ;;  %v51_v32 = vsel %vm49_vm2, %v50_v29, %v48_v30 }
 0x132   :  { %v60_v33 = vadd.f32 1e-06, %v51_v32  ;;  %v53_v34 = vmul.f32 %v5388_v31, %v44_v26  ;;  %v499_v32 = vld [vmem:[%s6413_s1 + $0xb0] sm:$0xff] }
 0x134   :  { %5389 = vrcp.f32 %v60_v33  ;;  %v55_v36 = vsel %vm54_vm3, %v44_v26, %v53_v34  ;;  %v498_v33 = vld [vmem:[%s6413_s1 + $0xa8] sm:$0xff]  ;;  %v497_v34 = vld [vmem:[%s6413_s1 + $0xa0] sm:$0xff] }
 0x135   :  { %v58_v37 = vsel %vm56_vm4, %v57_v35, %v55_v36  ;;  %v420_v36 = vld [vmem:[%s6414_s2 + $0x10] sm:$0xff] }
 0x136   :  { %v61_v38 = vadd.f32 1e-06, %v58_v37 }
 0x138   :  { %5391 = vrcp.f32 %v61_v38 }
 0x141   :  { %v5390_v39 = vpop.eup %5389 }
 0x142   :  { %v64_v41 = vmul.f32 %v5390_v39, %v33_v6  ;;  %v1078_v6 = vld [vmem:[%s6413_s1 + $0x70] sm:$0xff]  ;;  %v583_v39 = vld [vmem:[%s6414_s2 + $0x98] sm:$0xff] }
 0x144   :  { %v70_v43 = vmul.f32 %v4562_v40, %v64_v41 }
 0x145   :  { %v5392_v44 = vpop.eup %5391 }
 0x146   :  { %v5570_v45 = vadd.f32 %v4563_v42, %v70_v43  ;;  %v65_v46 = vmul.f32 %v5392_v44, %v5531_v10  ;;  %v1240_v10 = vld [vmem:[%s6413_s1 + $0x170] sm:$0xff]  ;;  %v5750_v44 = vld [vmem:[%s6412_s0 + $0x20] sm:$0xff] }
 0x148   :  { %v71_v47 = vmul.f32 %v4562_v40, %v65_v46  ;;  %4944 = vmatprep.mubr.msk.f32.mxu0 %vm23_vm0, %v5570_v45  ;;  %4955 = vmatprep.mubr.msk.f32.mxu1 %vm23_vm0, %v5570_v45 }
 0x14a   :  { %v5577_v48 = vadd.f32 %v4563_v42, %v71_v47  ;;  %v5745_v42 = vld [vmem:[%s6412_s0 + $0x28] sm:$0xff] }
 0x14c   :  { %4945 = vmatmul.mubr.msk.f32.vlgmr.msra.gmra.mxu0 %vm23_vm0, %v5577_v48  ;;  %4956 = vmatmul.mubr.msk.f32.vlgmr.msra.gmra.mxu1 %vm23_vm0, %v5577_v48 }
 0x14d   :  { %4959 = vmatpush3.msra.mxu0 %v250_v22  ;;  %4966 = vmatprep.mubr.msk.f32.mxu0 %vm23_vm0, %v5570_v45 }
 0x14e   :  { %4960 = vmatprep.subr.mxu0 %v249_v49 }
 0x14f   :  { %4961 = vmatpush3.msra.mxu0 %v249_v49 }
 0x150   :  { %4962 = vmatprep.subr.mxu0 %v248_v50 }
 0x151   :  { %4963 = vmatpush3.msra.mxu0 %v248_v50 }
 0x152   :  { %4964 = vmatprep.subr.mxu0 %v247_v51 }
 0x153   :  { %4965 = vmatpush3.msra.mxu0 %v247_v51 }
 0x154   :  { %4967 = vmatmul.mubr.msk.f32.vlgmr.msra.gmra.mxu0 %vm23_vm0, %v5577_v48  ;;  %4976 = vmatprep.subr.mxu0 %v419_v52 }
 0x155   :  { %4977 = vmatpush3.msra.mxu0 %v419_v52  ;;  %4984 = vmatprep.mubr.msk.f32.mxu0 %vm23_vm0, %v5570_v45  ;;  %v502_v52 = vld [vmem:[%s6414_s2 + $0x58] sm:$0xff] }
 0x156   :  { %4978 = vmatprep.subr.mxu0 %v418_v53 }
 0x157   :  { %4979 = vmatpush3.msra.mxu0 %v418_v53 }
 0x158   :  { %4980 = vmatprep.subr.mxu0 %v417_v54 }
 0x159   :  { %4981 = vmatpush3.msra.mxu0 %v417_v54  ;;  %v501_v54 = vld [vmem:[%s6414_s2 + $0x50] sm:$0xff] }
 0x15a   :  { %4982 = vmatprep.subr.mxu0 %v416_v55 }
 0x15b   :  { %4983 = vmatpush3.msra.mxu0 %v416_v55 }
 0x15c   :  { %4985 = vmatmul.mubr.msk.f32.vlgmr.msra.gmra.mxu0 %vm23_vm0, %v5577_v48  ;;  %4998 = vmatprep.subr.mxu0 %v581_v56 }
 0x15d   :  { %4999 = vmatpush3.msra.mxu0 %v581_v56  ;;  %5006 = vmatprep.mubr.msk.f32.mxu0 %vm23_vm0, %v5570_v45 }
 0x15e   :  { %5000 = vmatprep.subr.mxu0 %v580_v57 }
 0x15f   :  { %5001 = vmatpush3.msra.mxu0 %v580_v57 }
 0x160   :  { %5002 = vmatprep.subr.mxu0 %v579_v58 }
 0x161   :  { %5003 = vmatpush3.msra.mxu0 %v579_v58  ;;  %v421_v58 = vld [vmem:[%s6414_s2 + $0x18] sm:$0xff] }
 0x162   :  { %5004 = vmatprep.subr.mxu0 %v578_v59 }
 0x163   :  { %5005 = vmatpush3.msra.mxu0 %v578_v59  ;;  %v830_v59 = vld [vmem:[%s6413_s1 + $0xd8] sm:$0xff] }
 0x164   :  { %5007 = vmatmul.mubr.msk.f32.vlgmr.msra.gmra.mxu0 %vm23_vm0, %v5577_v48  ;;  %5016 = vmatprep.subr.mxu0 %v749_v60 }
 0x165   :  { %5017 = vmatpush3.msra.mxu0 %v749_v60  ;;  %5024 = vmatprep.mubr.msk.f32.mxu0 %vm23_vm0, %v5570_v45 }
 0x166   :  { %5018 = vmatprep.subr.mxu0 %v748_v61 }
 0x167   :  { %5019 = vmatpush3.msra.mxu0 %v748_v61 }
 0x168   :  { %5020 = vmatprep.subr.mxu0 %v747_v62 }
 0x169   :  { %5021 = vmatpush3.msra.mxu0 %v747_v62  ;;  %v829_v62 = vld [vmem:[%s6413_s1 + $0xd0] sm:$0xff] }
 0x16a   :  { %5022 = vmatprep.subr.mxu0 %v746_v63 }
 0x16b   :  { %5023 = vmatpush3.msra.mxu0 %v746_v63 }
 0x16c   :  { %5025 = vmatmul.mubr.msk.f32.vlgmr.msra.gmra.mxu0 %vm23_vm0, %v5577_v48  ;;  %5038 = vmatprep.subr.mxu0 %v911_v0 }
 0x16d   :  { %5039 = vmatpush3.msra.mxu0 %v911_v0  ;;  %5046 = vmatprep.mubr.msk.f32.mxu0 %vm23_vm0, %v5570_v45  ;;  %v828_v0 = vld [vmem:[%s6413_s1 + $0xc8] sm:$0xff] }
 0x16e   :  { %5040 = vmatprep.subr.mxu0 %v910_v2 }
 0x16f   :  { %5041 = vmatpush3.msra.mxu0 %v910_v2  ;;  %v827_v2 = vld [vmem:[%s6413_s1 + $0xc0] sm:$0xff] }
 0x170   :  { %5042 = vmatprep.subr.mxu0 %v909_v3 }
 0x171   :  { %5043 = vmatpush3.msra.mxu0 %v909_v3 }
 0x172   :  { %5044 = vmatprep.subr.mxu0 %v908_v4 }
 0x173   :  { %5045 = vmatpush3.msra.mxu0 %v908_v4  ;;  %v750_v4 = vld [vmem:[%s6414_s2 + $0x20] sm:$0xff] }
 0x174   :  { %5047 = vmatmul.mubr.msk.f32.vlgmr.msra.gmra.mxu0 %vm23_vm0, %v5577_v48  ;;  %5056 = vmatprep.subr.mxu0 %v1079_v5 }
 0x175   :  { %5057 = vmatpush3.msra.mxu0 %v1079_v5  ;;  %5064 = vmatprep.mubr.msk.f32.mxu0 %vm23_vm0, %v5570_v45 }
 0x176   :  { %5058 = vmatprep.subr.mxu0 %v1078_v6 }
 0x177   :  { %5059 = vmatpush3.msra.mxu0 %v1078_v6 }
 0x178   :  { %5060 = vmatprep.subr.mxu0 %v1077_v7 }
 0x179   :  { %5061 = vmatpush3.msra.mxu0 %v1077_v7 }
 0x17a   :  { %5062 = vmatprep.subr.mxu0 %v1076_v8 }
 0x17b   :  { %5063 = vmatpush3.msra.mxu0 %v1076_v8 }
 0x17c   :  { %5065 = vmatmul.mubr.msk.f32.vlgmr.msra.gmra.mxu0 %vm23_vm0, %v5577_v48  ;;  %5078 = vmatprep.subr.mxu0 %v1241_v9 }
 0x17d   :  { %5079 = vmatpush3.msra.mxu0 %v1241_v9  ;;  %5086 = vmatprep.mubr.msk.f32.mxu0 %vm23_vm0, %v5570_v45 }
 0x17e   :  { %5080 = vmatprep.subr.mxu0 %v1240_v10 }
 0x17f   :  { %5081 = vmatpush3.msra.mxu0 %v1240_v10 }
 0x180   :  { %5082 = vmatprep.subr.mxu0 %v1239_v11 }
 0x181   :  { %5083 = vmatpush3.msra.mxu0 %v1239_v11 }
 0x182   :  { %5084 = vmatprep.subr.mxu0 %v1238_v12 }
 0x183   :  { %5085 = vmatpush3.msra.mxu0 %v1238_v12 }
 0x184   :  { %5087 = vmatmul.mubr.msk.f32.vlgmr.msra.gmra.mxu0 %vm23_vm0, %v5577_v48 }
 0x20c   :  { %v4946_v14 = vpop.f32.mrf.mxu0  ;;  %v4957_v15 = vpop.f32.mrf.mxu1 }
 0x20d   :  { %v244_v18 = vadd.f32 %v4957_v15, %v171_v13  ;;  %v163_v28 = vadd.f32 %v4946_v14, %v84_v23  ;;  %v831_v23 = vld [vmem:[%s6414_s2 + $0x60] sm:$0xff] }
 0x20e   :  { %v157_v19 = vpop.f32.mrf.mxu0  ;;  %v238_v20 = vpop.f32.mrf.mxu1 }
 0x20f   :  { %v158_v21 = vadd.f32 %v157_v19, %v83_v16  ;;  %v239_v22 = vadd.f32 %v238_v20, %v170_v17  ;;  %4969 = vmatprep.subr.msk.mxu1 %vm328_vm5, %v244_v18  ;;  %v832_v20 = vld [vmem:[%s6414_s2 + $0x68] sm:$0xff] }
 0x210   :  { %4970 = vmatpush3.xpose.msk.msra.mxu1 %vm328_vm5, %v244_v18 }
 0x211   :  { %4971 = vmatprep.subr.msk.mxu1 %vm328_vm5, %v239_v22  ;;  %4973 = vmatprep.mubr.msk.f32.mxu1 %vm328_vm5, %v158_v21 }
 0x214   :  { %v4968_v26 = vpop.f32.mrf.mxu0  ;;  %4972 = vmatpush3.xpose.msk.msra.mxu1 %vm328_vm5, %v239_v22 }
 0x215   :  { %v325_v29 = vadd.f32 %v4968_v26, %v252_v24  ;;  %4987 = vmatprep.subr.mxu1 %v500_v25 }
 0x216   :  { %v319_v30 = vpop.f32.mrf.mxu0 }
 0x217   :  { %v320_v31 = vadd.f32 %v319_v30, %v251_v27  ;;  %5096 = vmatprep.subr.mxu0 %v325_v29  ;;  %4974 = vmatmul.mubr.msk.f32.vlgmr.msra.gmra.mxu1 %vm328_vm5, %v163_v28  ;;  %v1160_v30 = vld [vmem:[%s6413_s1 + $0xf8] sm:$0xff] }
 0x218   :  { %5097 = vmatpush3.msra.mxu0 %v325_v29  ;;  %4988 = vmatpush3.msra.mxu1 %v500_v25  ;;  %v751_v29 = vld [vmem:[%s6414_s2 + $0x28] sm:$0xff] }
 0x219   :  { %4995 = vmatprep.mubr.msk.f32.mxu1 %vm23_vm0, %v5570_v45  ;;  %5098 = vmatprep.subr.mxu0 %v320_v31 }
 0x21a   :  { %4989 = vmatprep.subr.mxu1 %v499_v32  ;;  %5099 = vmatpush3.msra.mxu0 %v320_v31 }
 0x21b   :  { %4990 = vmatpush3.msra.mxu1 %v499_v32 }
 0x21c   :  { %v4986_v35 = vpop.f32.mrf.mxu0  ;;  %4991 = vmatprep.subr.mxu1 %v498_v33 }
 0x21d   :  { %4992 = vmatpush3.msra.mxu1 %v498_v33  ;;  %v494_v60 = vadd.f32 %v4986_v35, %v421_v58  ;;  %v1159_v33 = vld [vmem:[%s6413_s1 + $0xf0] sm:$0xff]  ;;  %v1158_v35 = vld [vmem:[%s6413_s1 + $0xe8] sm:$0xff] }
 0x21e   :  { %v488_v37 = vpop.f32.mrf.mxu0  ;;  %4993 = vmatprep.subr.mxu1 %v497_v34 }
 0x21f   :  { %v489_v38 = vadd.f32 %v488_v37, %v420_v36  ;;  %4994 = vmatpush3.msra.mxu1 %v497_v34  ;;  %v1157_v36 = vld [vmem:[%s6413_s1 + $0xe0] sm:$0xff] }
 0x220   :  { %4996 = vmatmul.mubr.msk.f32.vlgmr.msra.gmra.mxu1 %vm23_vm0, %v5577_v48 }
 0x221   :  { %5013 = vmatprep.mubr.msk.f32.mxu1 %vm328_vm5, %v489_v38  ;;  %v1080_v38 = vld [vmem:[%s6414_s2 + $0x30] sm:$0xff] }
 0x224   :  { %v5008_v40 = vpop.f32.mrf.mxu0 }
 0x225   :  { %v5739_v41 = vadd.f32 %v5008_v40, %v583_v39 }
 0x226   :  { %v5772_v61 = vpop.f32.mrf.mxu0 }
 0x227   :  { %5103 = vmatprep.subr.mxu0 %v5739_v41 }
 0x22c   :  { %v5026_v63 = vpop.f32.mrf.mxu0 }
 0x22d   :  { %v824_v31 = vadd.f32 %v5026_v63, %v751_v29 }
 0x22e   :  { %v818_v3 = vpop.f32.mrf.mxu0 }
 0x22f   :  { %v819_v5 = vadd.f32 %v818_v3, %v750_v4 }
 0x234   :  { %v5809_v28 = vpop.f32.mrf.mxu0 }
 0x236   :  { %v5819_v32 = vpop.f32.mrf.mxu0 }
 0x23c   :  { %v5824_v34 = vpop.f32.mrf.mxu0 }
 0x23e   :  { %v1148_v37 = vpop.f32.mrf.mxu0 }
 0x23f   :  { %v1149_v39 = vadd.f32 %v1148_v37, %v1080_v38 }
 0x2d7   :  { %v4975_v43 = vpop.f32.mrf.mxu1 }
 0x2d8   :  { %v413_v46 = vadd.f32 %v4975_v43, %v5745_v42 }
 0x2d9   :  { %v407_v47 = vpop.f32.mrf.mxu1 }
 0x2da   :  { %v408_v49 = vadd.f32 %v407_v47, %v5750_v44  ;;  %v1410_v50 = vsel %vm1406_vm6, %v413_v46, -inf }
 0x2db   :  { %1411 = vmax.xlane.f32.xlu1 %v1410_v50 }
 0x2dc   :  { %v1407_v51 = vsel %vm1406_vm6, %v408_v49, -inf }
 0x2dd   :  { %1408 = vmax.xlane.f32.xlu0 %v1407_v51 }
 0x2e0   :  { %v4997_v53 = vpop.f32.mrf.mxu1 }
 0x2e1   :  { %v575_v55 = vadd.f32 %v4997_v53, %v502_v52 }
 0x2e2   :  { %v569_v56 = vpop.f32.mrf.mxu1 }
 0x2e3   :  { %v570_v57 = vadd.f32 %v569_v56, %v501_v54  ;;  %5009 = vmatprep.subr.msk.mxu1 %vm328_vm5, %v575_v55 }
 0x2e4   :  { %5010 = vmatpush3.xpose.msk.msra.mxu1 %vm328_vm5, %v575_v55 }
 0x2e5   :  { %5011 = vmatprep.subr.msk.mxu1 %vm328_vm5, %v570_v57 }
 0x2e8   :  { %5012 = vmatpush3.xpose.msk.msra.mxu1 %vm328_vm5, %v570_v57  ;;  %v582_v57 = vld [vmem:[%s6414_s2 + $0x90] sm:$0xff] }
 0x2e9   :  { %5027 = vmatprep.subr.mxu1 %v830_v59 }
 0x2eb   :  { %5014 = vmatmul.mubr.msk.f32.vlgmr.msra.gmra.mxu1 %vm328_vm5, %v494_v60  ;;  %v651_v60 = vadd.f32 %v5772_v61, %v582_v57 }
 0x2ec   :  { %5028 = vmatpush3.msra.mxu1 %v830_v59  ;;  %5035 = vmatprep.mubr.msk.f32.mxu1 %vm23_vm0, %v5570_v45 }
 0x2ed   :  { %5029 = vmatprep.subr.mxu1 %v829_v62 }
 0x2ee   :  { %5030 = vmatpush3.msra.mxu1 %v829_v62  ;;  %v1658_v62 = vld [vmem:[%s6413_s1 + $0x308] sm:$0xff] }
 0x2ef   :  { %5031 = vmatprep.subr.mxu1 %v828_v0 }
 0x2f0   :  { %5032 = vmatpush3.msra.mxu1 %v828_v0 }
 0x2f1   :  { %5033 = vmatprep.subr.mxu1 %v827_v2 }
 0x2f2   :  { %5034 = vmatpush3.msra.mxu1 %v827_v2 }
 0x2f3   :  { %5036 = vmatmul.mubr.msk.f32.vlgmr.msra.gmra.mxu1 %vm23_vm0, %v5577_v48 }
 0x2f4   :  { %5053 = vmatprep.mubr.msk.f32.mxu1 %vm328_vm5, %v819_v5 }
 0x364   :  { %v1412_v6 = vpop.xlane.xlu1 %1411 }
 0x365   :  { %v1432_v8 = vsub.f32 %v413_v46, %v1412_v6  ;;  %v1161_v6 = vld [vmem:[%s6414_s2 + $0x70] sm:$0xff] }
 0x366   :  { %v1409_v7 = vpop.xlane.xlu0 %1408 }
 0x367   :  { %v1431_v9 = vsub.f32 %v408_v49, %v1409_v7  ;;  %v1441_v10 = vmul.f32 1.442695, %v1432_v8 }
 0x369   :  { %v1439_v11 = vmul.f32 1.442695, %v1431_v9  ;;  %5393 = vpow2.f32 %v1441_v10  ;;  %v1081_v10 = vld [vmem:[%s6414_s2 + $0x38] sm:$0xff] }
 0x36b   :  { %5395 = vpow2.f32 %v1439_v11  ;;  %v1154_v11 = vadd.f32 %v5824_v34, %v1081_v10 }
 0x376   :  { %v5795_v17 = vpop.eup %5393 }
 0x377   :  { %v1458_v21 = vsel %vm1406_vm6, %v5795_v17, 0.0 }
 0x378   :  { %v5396_v19 = vpop.eup %5395 }
 0x379   :  { %v1455_v25 = vsel %vm1406_vm6, %v5396_v19, 0.0 }
 0x3ab   :  { %v5015_v12 = vpop.f32.mrf.mxu1 }
 0x3ac   :  { %v743_v13 = vadd.f32 %v5015_v12, %v5745_v42  ;;  %v1576_v12 = vld [vmem:[%s6413_s1 + $0x300] sm:$0xff] }
 0x3ad   :  { %v737_v14 = vpop.f32.mrf.mxu1 }
 0x3ae   :  { %v738_v15 = vadd.f32 %v737_v14, %v5750_v44  ;;  %v1416_v16 = vsel %vm1406_vm6, %v743_v13, -inf }
 0x3af   :  { %1417 = vmax.xlane.f32.xlu1 %v1416_v16 }
 0x3b0   :  { %v1413_v18 = vsel %vm1406_vm6, %v738_v15, -inf }
 0x3b1   :  { %1414 = vmax.xlane.f32.xlu0 %v1413_v18 }
 0x3b3   :  { %1459 = vadd.xlane.f32.xlu1 %v1458_v21  ;;  %v5037_v22 = vpop.f32.mrf.mxu1  ;;  %v5088_v21 = vpop.f32.mrf.mxu0 }
 0x3b4   :  { %v905_v24 = vadd.f32 %v5037_v22, %v832_v20 }
 0x3b5   :  { %v899_v26 = vpop.f32.mrf.mxu1  ;;  %1456 = vadd.xlane.f32.xlu0 %v1455_v25  ;;  %v5882_v22 = vpop.f32.mrf.mxu0 }
 0x3b6   :  { %v900_v27 = vadd.f32 %v899_v26, %v831_v23  ;;  %5049 = vmatprep.subr.msk.mxu1 %vm328_vm5, %v905_v24 }
 0x3b7   :  { %5050 = vmatpush3.xpose.msk.msra.mxu1 %vm328_vm5, %v905_v24 }
 0x3b8   :  { %5051 = vmatprep.subr.msk.mxu1 %vm328_vm5, %v900_v27 }
 0x3bb   :  { %5052 = vmatpush3.xpose.msk.msra.mxu1 %vm328_vm5, %v900_v27 }
 0x3bc   :  { %5067 = vmatprep.subr.mxu1 %v1160_v30 }
 0x3be   :  { %5054 = vmatmul.mubr.msk.f32.vlgmr.msra.gmra.mxu1 %vm328_vm5, %v824_v31 }
 0x3bf   :  { %5068 = vmatpush3.msra.mxu1 %v1160_v30  ;;  %5075 = vmatprep.mubr.msk.f32.mxu1 %vm23_vm0, %v5570_v45 }
 0x3c0   :  { %5069 = vmatprep.subr.mxu1 %v1159_v33 }
 0x3c1   :  { %5070 = vmatpush3.msra.mxu1 %v1159_v33 }
 0x3c2   :  { %5071 = vmatprep.subr.mxu1 %v1158_v35 }
 0x3c3   :  { %5072 = vmatpush3.msra.mxu1 %v1158_v35 }
 0x3c4   :  { %5073 = vmatprep.subr.mxu1 %v1157_v36 }
 0x3c5   :  { %5074 = vmatpush3.msra.mxu1 %v1157_v36 }
 0x3c6   :  { %5076 = vmatmul.mubr.msk.f32.vlgmr.msra.gmra.mxu1 %vm23_vm0, %v5577_v48 }
 0x3c7   :  { %5093 = vmatprep.mubr.msk.f32.mxu1 %vm328_vm5, %v1149_v39 }
 0x438   :  { %v1418_v45 = vpop.xlane.xlu1 %1417 }
 0x439   :  { %v1434_v40 = vsub.f32 %v743_v13, %v1418_v45 }
 0x43a   :  { %v1415_v43 = vpop.xlane.xlu0 %1414 }
 0x43b   :  { %v1445_v46 = vmul.f32 1.442695, %v1434_v40  ;;  %v1433_v47 = vsub.f32 %v738_v15, %v1415_v43 }
 0x43c   :  { %v1460_v49 = vpop.xlane.xlu1 %1459 }
 0x43d   :  { %5397 = vpow2.f32 %v1445_v46  ;;  %v1443_v50 = vmul.f32 1.442695, %v1433_v47  ;;  %v1243_v46 = vld [vmem:[%s6414_s2 + $0xb8] sm:$0xff] }
 0x43e   :  { %5399 = vrcp.f32 %v1460_v49  ;;  %v1457_v51 = vpop.xlane.xlu0 %1456  ;;  %v1316_v49 = vadd.f32 %v5088_v21, %v1243_v46 }
 0x43f   :  { %5401 = vpow2.f32 %v1443_v50 }
 0x440   :  { %5403 = vrcp.f32 %v1457_v51 }
 0x44a   :  { %v5398_v52 = vpop.eup %5397 }
 0x44b   :  { %v5400_v53 = vpop.eup %5399  ;;  %v1464_v54 = vsel %vm1406_vm6, %v5398_v52, 0.0 }
 0x44c   :  { %v5402_v55 = vpop.eup %5401  ;;  %1465 = vadd.xlane.f32.xlu1 %v1464_v54  ;;  %v1488_v59 = vmul.f32 %v5400_v53, %v5795_v17  ;;  %v913_v17 = vld [vmem:[%s6414_s2 + $0xa8] sm:$0xff] }
 0x44d   :  { %v5404_v48 = vpop.eup %5403  ;;  %v1461_v56 = vsel %vm1406_vm6, %v5402_v55, 0.0  ;;  %v986_v20 = vadd.f32 %v5809_v28, %v913_v17 }
 0x44e   :  { %1462 = vadd.xlane.f32.xlu0 %v1461_v56  ;;  %v1487_v58 = vmul.f32 %v5404_v48, %v5396_v19 }
 0x450   :  { %5100 = vmatprep.mubr.msk.f32.mxu0 %vm1406_vm6, %v1487_v58 }
 0x451   :  { %5101 = vmatmul.mubr.msk.f32.vlgmr.msra.gmra.mxu0 %vm1406_vm6, %v1488_v59 }
 0x452   :  { %5104 = vmatpush3.msra.mxu0 %v5739_v41  ;;  %v1162_v41 = vld [vmem:[%s6414_s2 + $0x78] sm:$0xff] }
 0x453   :  { %5105 = vmatprep.subr.mxu0 %v651_v60 }
 0x454   :  { %5106 = vmatpush3.msra.mxu0 %v651_v60 }
 0x455   :  { %5110 = vmatprep.subr.mxu0 %v1658_v62 }
 0x47e   :  { %v5055_v63 = vpop.f32.mrf.mxu1 }
 0x47f   :  { %v1073_v0 = vadd.f32 %v5055_v63, %v5745_v42  ;;  %v1242_v63 = vld [vmem:[%s6414_s2 + $0xb0] sm:$0xff] }
 0x480   :  { %v1067_v2 = vpop.f32.mrf.mxu1 }
 0x481   :  { %v1068_v3 = vadd.f32 %v1067_v2, %v5750_v44  ;;  %v1422_v4 = vsel %vm1406_vm6, %v1073_v0, -inf }
 0x482   :  { %1423 = vmax.xlane.f32.xlu1 %v1422_v4  ;;  %v1902_v4 = vld [vmem:[%s6413_s1 + $0x310] sm:$0xff] }
 0x483   :  { %v1419_v61 = vsel %vm1406_vm6, %v1068_v3, -inf }
 0x484   :  { %1420 = vmax.xlane.f32.xlu0 %v1419_v61  ;;  %v2067_v61 = vld [vmem:[%s6413_s1 + $0x318] sm:$0xff] }
 0x486   :  { %v5077_v5 = vpop.f32.mrf.mxu1 }
 0x487   :  { %v1235_v7 = vadd.f32 %v5077_v5, %v1162_v41 }
 0x488   :  { %v1229_v8 = vpop.f32.mrf.mxu1 }
 0x489   :  { %v1230_v9 = vadd.f32 %v1229_v8, %v1161_v6  ;;  %5089 = vmatprep.subr.msk.mxu1 %vm328_vm5, %v1235_v7 }
 0x48a   :  { %5090 = vmatpush3.xpose.msk.msra.mxu1 %vm328_vm5, %v1235_v7 }
 0x48b   :  { %5091 = vmatprep.subr.msk.mxu1 %vm328_vm5, %v1230_v9 }
 0x48e   :  { %5092 = vmatpush3.xpose.msk.msra.mxu1 %vm328_vm5, %v1230_v9 }
 0x48f   :  { %5115 = vmatprep.subr.mxu1 %v1576_v12 }
 0x491   :  { %5094 = vmatmul.mubr.msk.f32.vlgmr.msra.gmra.mxu1 %vm328_vm5, %v1154_v11 }
 0x492   :  { %5116 = vmatpush3.msra.mxu1 %v1576_v12 }
 0x493   :  { %5127 = vmatprep.subr.mxu1 %v1902_v4 }
 0x4d5   :  { %v1466_v13 = vpop.xlane.xlu1 %1465 }
 0x4d6   :  { %5405 = vrcp.f32 %v1466_v13 }
 0x4d7   :  { %v1463_v14 = vpop.xlane.xlu0 %1462 }
 0x4d8   :  { %5407 = vrcp.f32 %v1463_v14 }
 0x4e3   :  { %v5406_v15 = vpop.eup %5405 }
 0x4e4   :  { %v1490_v19 = vmul.f32 %v5406_v15, %v5398_v52 }
 0x4e5   :  { %v5408_v16 = vpop.eup %5407 }
 0x4e6   :  { %v1489_v18 = vmul.f32 %v5408_v16, %v5402_v55 }
 0x4e8   :  { %5107 = vmatprep.mubr.msk.f32.mxu0 %vm1406_vm6, %v1489_v18 }
 0x4e9   :  { %5108 = vmatmul.mubr.msk.f32.vlgmr.msra.gmra.mxu0 %vm1406_vm6, %v1490_v19 }
 0x4ea   :  { %5111 = vmatpush3.msra.mxu0 %v1658_v62 }
 0x4eb   :  { %5120 = vmatprep.subr.mxu0 %v986_v20 }
 0x50b   :  { %v1424_v25 = vpop.xlane.xlu1 %1423 }
 0x50c   :  { %v1436_v27 = vsub.f32 %v1073_v0, %v1424_v25 }
 0x50d   :  { %v1421_v26 = vpop.xlane.xlu0 %1420 }
 0x50e   :  { %v1435_v29 = vsub.f32 %v1068_v3, %v1421_v26  ;;  %v1449_v30 = vmul.f32 1.442695, %v1436_v27  ;;  %v1311_v3 = vadd.f32 %v5882_v22, %v1242_v63 }
 0x510   :  { %v1447_v31 = vmul.f32 1.442695, %v1435_v29  ;;  %5409 = vpow2.f32 %v1449_v30 }
 0x511   :  { %v5102_v23 = vpop.f32.mrf.mxu0 }
 0x512   :  { %5411 = vpow2.f32 %v1447_v31 }
 0x513   :  { %v1567_v24 = vpop.f32.mrf.mxu0 }
 0x514   :  { %5117 = vmatprep.mubr.msk.f32.mxu1 %vm328_vm5, %v1567_v24  ;;  %v4620_v24 = vld [vmem:[%s6414_s2 + $0x180] ss:$0 sm:$0xff] }
 0x515   :  { %5118 = vmatmul.mubr.msk.f32.vlgmr.msra.gmra.mxu1 %vm328_vm5, %v5102_v23 }
 0x516   :  { %5128 = vmatpush3.msra.mxu1 %v1902_v4 }
 0x517   :  { %5139 = vmatprep.subr.mxu1 %v2067_v61 }
 0x51d   :  { %v5410_v37 = vpop.eup %5409 }
 0x51e   :  { %v1470_v45 = vsel %vm1406_vm6, %v5410_v37, 0.0 }
 0x51f   :  { %v5412_v39 = vpop.eup %5411 }
 0x520   :  { %v1467_v40 = vsel %vm1406_vm6, %v5412_v39, 0.0 }
 0x551   :  { %v5095_v28 = vpop.f32.mrf.mxu1 }
 0x552   :  { %v1403_v33 = vadd.f32 %v5095_v28, %v5745_v42  ;;  %v912_v42 = vld [vmem:[%s6414_s2 + $0xa0] sm:$0xff] }
 0x553   :  { %v1397_v34 = vpop.f32.mrf.mxu1  ;;  %v981_v47 = vadd.f32 %v5819_v32, %v912_v42 }
 0x554   :  { %v1398_v35 = vadd.f32 %v1397_v34, %v5750_v44  ;;  %v1428_v36 = vsel %vm1406_vm6, %v1403_v33, -inf }
 0x555   :  { %1429 = vmax.xlane.f32.xlu1 %v1428_v36 }
 0x556   :  { %v1425_v38 = vsel %vm1406_vm6, %v1398_v35, -inf }
 0x557   :  { %1426 = vmax.xlane.f32.xlu0 %v1425_v38 }
 0x559   :  { %1471 = vadd.xlane.f32.xlu1 %v1470_v45 }
 0x55b   :  { %1468 = vadd.xlane.f32.xlu0 %v1467_v40 }
 0x5a9   :  { %v5109_v43 = vpop.f32.mrf.mxu0 }
 0x5ab   :  { %v1649_v44 = vpop.f32.mrf.mxu0 }
 0x5ac   :  { %5112 = vmatprep.mubr.msk.f32.mxu0 %vm328_vm5, %v1649_v44 }
 0x5ad   :  { %5113 = vmatmul.mubr.msk.f32.vlgmr.msra.gmra.mxu0 %vm328_vm5, %v5109_v43 }
 0x5ae   :  { %5121 = vmatpush3.msra.mxu0 %v986_v20 }
 0x5af   :  { %5122 = vmatprep.subr.mxu0 %v981_v47 }
 0x5b0   :  { %5123 = vmatpush3.msra.mxu0 %v981_v47  ;;  %v2304_v47 = vld [vmem:[%s6413_s1 + $0x218] sm:$0xff] }
 0x5b1   :  { %5132 = vmatprep.subr.mxu0 %v1316_v49 }
 0x5d5   :  { %v5119_v16 = vpop.f32.mrf.mxu1 }
 0x5d7   :  { %v1812_v17 = vpop.f32.mrf.mxu1 }
 0x5de   :  { %v1430_v50 = vpop.xlane.xlu1 %1429 }
 0x5df   :  { %v1438_v51 = vsub.f32 %v1403_v33, %v1430_v50  ;;  %v5473_v33 = vld [vmem:[%s6412_s0] sm:$0xff]  ;;  %v5957_v50 = vld [vmem:[%s6412_s0 + $0x10] sm:$0xff] }
 0x5e0   :  { %v1427_v52 = vpop.xlane.xlu0 %1426 }
 0x5e1   :  { %v1453_v53 = vmul.f32 1.442695, %v1438_v51  ;;  %v1437_v54 = vsub.f32 %v1398_v35, %v1427_v52  ;;  %v2302_v51 = vld [vmem:[%s6413_s1 + $0x208] sm:$0xff]  ;;  %v2217_v52 = vld [vmem:[%s6413_s1 + $0x198] sm:$0xff] }
 0x5e2   :  { %v1472_v55 = vpop.xlane.xlu1 %1471 }
 0x5e3   :  { %5413 = vpow2.f32 %v1453_v53  ;;  %v1451_v48 = vmul.f32 1.442695, %v1437_v54  ;;  %v2216_v53 = vld [vmem:[%s6413_s1 + $0x190] sm:$0xff]  ;;  %v2301_v54 = vld [vmem:[%s6413_s1 + $0x200] sm:$0xff] }
 0x5e4   :  { %5415 = vrcp.f32 %v1472_v55  ;;  %v1469_v56 = vpop.xlane.xlu0 %1468  ;;  %v2215_v55 = vld [vmem:[%s6413_s1 + $0x188] sm:$0xff] }
 0x5e5   :  { %5417 = vpow2.f32 %v1451_v48  ;;  %v5979_v48 = vld [vmem:[%s6412_s0 + $0x18] sm:$0xff] }
 0x5e6   :  { %5419 = vrcp.f32 %v1469_v56  ;;  %v2214_v56 = vld [vmem:[%s6413_s1 + $0x180] sm:$0xff] }
 0x5f0   :  { %v5414_v32 = vpop.eup %5413 }
 0x5f1   :  { %v5416_v57 = vpop.eup %5415  ;;  %v1476_v58 = vsel %vm1406_vm6, %v5414_v32, 0.0 }
 0x5f2   :  { %v5418_v59 = vpop.eup %5417  ;;  %1477 = vadd.xlane.f32.xlu1 %v1476_v58  ;;  %v1492_v2 = vmul.f32 %v5416_v57, %v5410_v37 }
 0x5f3   :  { %v5420_v60 = vpop.eup %5419  ;;  %v1473_v62 = vsel %vm1406_vm6, %v5418_v59, 0.0 }
 0x5f4   :  { %1474 = vadd.xlane.f32.xlu0 %v1473_v62  ;;  %v1491_v0 = vmul.f32 %v5420_v60, %v5412_v39 }
 0x5f6   :  { %5124 = vmatprep.mubr.msk.f32.mxu0 %vm1406_vm6, %v1491_v0 }
 0x5f7   :  { %5125 = vmatmul.mubr.msk.f32.vlgmr.msra.gmra.mxu0 %vm1406_vm6, %v1492_v2 }
 0x5f8   :  { %5133 = vmatpush3.msra.mxu0 %v1316_v49  ;;  %v2303_v49 = vld [vmem:[%s6413_s1 + $0x210] sm:$0xff] }
 0x5f9   :  { %5134 = vmatprep.subr.mxu0 %v1311_v3 }
 0x5fa   :  { %5135 = vmatpush3.msra.mxu0 %v1311_v3 }
 0x5fb   :  { %5144 = vmatprep.subr.mxu0 %v2217_v52 }
 0x66d   :  { %v5114_v10 = vpop.f32.mrf.mxu0 }
 0x66e   :  { %v1818_v19 = vadd.f32 %v5119_v16, %v5114_v10  ;;  %v4622_v16 = vld [vmem:[%s6414_s2 + $0x1b8] ss:$0 sm:$0xff] }
 0x66f   :  { %v1731_v11 = vpop.f32.mrf.mxu0 }
 0x670   :  { %v1813_v21 = vadd.f32 %v1812_v17, %v1731_v11  ;;  %v4621_v11 = vld [vmem:[%s6414_s2 + $0x1b0] ss:$0 sm:$0xff] }
 0x67b   :  { %v1478_v41 = vpop.xlane.xlu1 %1477 }
 0x67c   :  { %5421 = vrcp.f32 %v1478_v41 }
 0x67d   :  { %v1475_v5 = vpop.xlane.xlu0 %1474 }
 0x67e   :  { %5423 = vrcp.f32 %v1475_v5 }
 0x689   :  { %v5422_v6 = vpop.eup %5421 }
 0x68a   :  { %v1494_v9 = vmul.f32 %v5422_v6, %v5414_v32  ;;  %v2391_v32 = vld [vmem:[%s6413_s1 + $0x298] sm:$0xff] }
 0x68b   :  { %v5424_v7 = vpop.eup %5423 }
 0x68c   :  { %v1493_v8 = vmul.f32 %v5424_v7, %v5418_v59 }
 0x68e   :  { %5136 = vmatprep.mubr.msk.f32.mxu0 %vm1406_vm6, %v1493_v8 }
 0x68f   :  { %5137 = vmatmul.mubr.msk.f32.vlgmr.msra.gmra.mxu0 %vm1406_vm6, %v1494_v9 }
 0x690   :  { %5145 = vmatpush3.msra.mxu0 %v2217_v52 }
 0x691   :  { %5146 = vmatprep.subr.mxu0 %v2216_v53 }
 0x692   :  { %5147 = vmatpush3.msra.mxu0 %v2216_v53  ;;  %v2640_v53 = vld [vmem:[%s6413_s1 + $0x238] sm:$0xff] }
 0x693   :  { %5148 = vmatprep.subr.mxu0 %v2215_v55 }
 0x694   :  { %5149 = vmatpush3.msra.mxu0 %v2215_v55 }
 0x695   :  { %5150 = vmatprep.subr.mxu0 %v2214_v56 }
 0x696   :  { %5151 = vmatpush3.msra.mxu0 %v2214_v56  ;;  %v2218_v56 = vld [vmem:[%s6414_s2 + $0xc0] sm:$0xff] }
 0x697   :  { %5166 = vmatprep.subr.mxu0 %v2391_v32 }
 0x6b7   :  { %v5126_v12 = vpop.f32.mrf.mxu0 }
 0x6b9   :  { %v1893_v13 = vpop.f32.mrf.mxu0 }
 0x6ba   :  { %5129 = vmatprep.mubr.msk.f32.mxu1 %vm328_vm5, %v1893_v13 }
 0x6bb   :  { %5130 = vmatmul.mubr.msk.f32.vlgmr.msra.gmra.mxu1 %vm328_vm5, %v5126_v12 }
 0x6bc   :  { %5140 = vmatpush3.msra.mxu1 %v2067_v61 }
 0x6bd   :  { %5155 = vmatprep.subr.mxu1 %v2304_v47 }
 0x74f   :  { %v5138_v14 = vpop.f32.mrf.mxu0 }
 0x751   :  { %v2058_v15 = vpop.f32.mrf.mxu0 }
 0x752   :  { %5141 = vmatprep.mubr.msk.f32.mxu1 %vm328_vm5, %v2058_v15 }
 0x753   :  { %5142 = vmatmul.mubr.msk.f32.vlgmr.msra.gmra.mxu1 %vm328_vm5, %v5138_v14 }
 0x754   :  { %5156 = vmatpush3.msra.mxu1 %v2304_v47  ;;  %5163 = vmatprep.mubr.msk.f32.mxu1 %vm23_vm0, %v5957_v50  ;;  %v2305_v47 = vld [vmem:[%s6414_s2 + $0x100] sm:$0xff] }
 0x755   :  { %5157 = vmatprep.subr.mxu1 %v2303_v49 }
 0x756   :  { %5158 = vmatpush3.msra.mxu1 %v2303_v49 }
 0x757   :  { %5159 = vmatprep.subr.mxu1 %v2302_v51 }
 0x758   :  { %5160 = vmatpush3.msra.mxu1 %v2302_v51 }
 0x759   :  { %5161 = vmatprep.subr.mxu1 %v2301_v54 }
 0x75a   :  { %5162 = vmatpush3.msra.mxu1 %v2301_v54  ;;  %v3381_v54 = vld [vmem:[%s6413_s1 + $0x2f8] sm:$0xff] }
 0x75b   :  { %5164 = vmatmul.mubr.msk.f32.vlgmr.msra.gmra.mxu1 %vm23_vm0, %v5979_v48 }
 0x77b   :  { %v5131_v18 = vpop.f32.mrf.mxu1 }
 0x77c   :  { %v1985_v22 = vadd.f32 %v5131_v18, %v1818_v19  ;;  %v2390_v19 = vld [vmem:[%s6413_s1 + $0x290] sm:$0xff] }
 0x77d   :  { %v1975_v20 = vpop.f32.mrf.mxu1 }
 0x77e   :  { %v1984_v25 = vadd.f32 %v1975_v20, %v1813_v21  ;;  %v2389_v20 = vld [vmem:[%s6413_s1 + $0x288] sm:$0xff]  ;;  %v2388_v21 = vld [vmem:[%s6413_s1 + $0x280] sm:$0xff] }
 0x813   :  { %v5143_v23 = vpop.f32.mrf.mxu1 }
 0x814   :  { %v2150_v26 = vadd.f32 %v5143_v23, %v1985_v22  ;;  %v2559_v22 = vld [vmem:[%s6413_s1 + $0x1b8] sm:$0xff]  ;;  %v2558_v23 = vld [vmem:[%s6413_s1 + $0x1b0] sm:$0xff] }
 0x815   :  { %v2140_v27 = vpop.f32.mrf.mxu1 }
 0x816   :  { %v2157_v29 = vadd.f32 %v4620_v24, %v2150_v26  ;;  %v2149_v30 = vadd.f32 %v2140_v27, %v1984_v25  ;;  %v2556_v25 = vld [vmem:[%s6413_s1 + $0x1a0] sm:$0xff]  ;;  %v2721_v26 = vld [vmem:[%s6413_s1 + $0x2b8] sm:$0xff]  ;;  %v2720_v27 = vld [vmem:[%s6413_s1 + $0x2b0] sm:$0xff] }
 0x818   :  { %v5925_v31 = vadd.f32 %v2157_v29, %v5525_v1  ;;  %v2156_v28 = vadd.f32 %v4620_v24, %v2149_v30  ;;  %v2557_v24 = vld [vmem:[%s6413_s1 + $0x1a8] sm:$0xff]  ;;  %v2718_v30 = vld [vmem:[%s6413_s1 + $0x2a0] sm:$0xff] }
 0x819   :  { %v2719_v29 = vld [vmem:[%s6413_s1 + $0x2a8] sm:$0xff] }
 0x81a   :  { %v5930_v34 = vadd.f32 %v5473_v33, %v2156_v28  ;;  %v2163_v35 = vsel %vm23_vm0, %v5925_v31, 0.0  ;;  %v2889_v28 = vld [vmem:[%s6413_s1 + $0x1d8] sm:$0xff]  ;;  %v2888_v33 = vld [vmem:[%s6413_s1 + $0x1d0] sm:$0xff] }
 0x81b   :  { %2164 = vadd.xlane.f32.xlu1 %v2163_v35  ;;  %v2887_v35 = vld [vmem:[%s6413_s1 + $0x1c8] sm:$0xff] }
 0x81c   :  { %v2160_v36 = vsel %vm23_vm0, %v5930_v34, 0.0 }
 0x81d   :  { %2161 = vadd.xlane.f32.xlu0 %v2160_v36  ;;  %v2886_v36 = vld [vmem:[%s6413_s1 + $0x1c0] sm:$0xff] }
 0x8a4   :  { %v2165_v37 = vpop.xlane.xlu1 %2164 }
 0x8a5   :  { %v2167_v38 = vmul.f32 0.03125, %v2165_v37  ;;  %v3051_v37 = vld [vmem:[%s6413_s1 + $0x2d8] sm:$0xff] }
 0x8a6   :  { %v2162_v39 = vpop.xlane.xlu0 %2161 }
 0x8a7   :  { %v5937_v1 = vsub.f32 %v5925_v31, %v2167_v38  ;;  %v2166_v45 = vmul.f32 0.03125, %v2162_v39  ;;  %v3050_v38 = vld [vmem:[%s6413_s1 + $0x2d0] sm:$0xff]  ;;  %v3049_v39 = vld [vmem:[%s6413_s1 + $0x2c8] sm:$0xff] }
 0x8a9   :  { %v5940_v40 = vsub.f32 %v5930_v34, %v2166_v45  ;;  %v2171_v43 = vmul.f32 %v5937_v1, %v5937_v1  ;;  %v3219_v45 = vld [vmem:[%s6413_s1 + $0x1f8] sm:$0xff] }
 0x8ab   :  { %v2175_v42 = vsel %vm23_vm0, %v2171_v43, 0.0  ;;  %v2170_v44 = vmul.f32 %v5940_v40, %v5940_v40  ;;  %v3217_v43 = vld [vmem:[%s6413_s1 + $0x1e8] sm:$0xff] }
 0x8ac   :  { %2176 = vadd.xlane.f32.xlu1 %v2175_v42  ;;  %v3216_v42 = vld [vmem:[%s6413_s1 + $0x1e0] sm:$0xff] }
 0x8ad   :  { %v2172_v46 = vsel %vm23_vm0, %v2170_v44, 0.0  ;;  %v2306_v44 = vld [vmem:[%s6414_s2 + $0x108] sm:$0xff] }
 0x8ae   :  { %2173 = vadd.xlane.f32.xlu0 %v2172_v46  ;;  %v5165_v46 = vpop.f32.mrf.mxu1 }
 0x8af   :  { %v2385_v49 = vadd.f32 %v5165_v46, %v2306_v44  ;;  %v2971_v44 = vld [vmem:[%s6414_s2 + $0x120] sm:$0xff] }
 0x8b0   :  { %v2379_v51 = vpop.f32.mrf.mxu1 }
 0x8b1   :  { %5177 = vmatprep.subr.msk.mxu1 %vm328_vm5, %v2385_v49  ;;  %v2380_v52 = vadd.f32 %v2379_v51, %v2305_v47 }
 0x8b2   :  { %5178 = vmatpush3.xpose.msk.msra.mxu1 %vm328_vm5, %v2385_v49 }
 0x8b3   :  { %5179 = vmatprep.subr.msk.mxu1 %vm328_vm5, %v2380_v52 }
 0x8b6   :  { %5180 = vmatpush3.xpose.msk.msra.mxu1 %vm328_vm5, %v2380_v52  ;;  %v2891_v52 = vld [vmem:[%s6414_s2 + $0xe8] sm:$0xff] }
 0x8b7   :  { %5195 = vmatprep.subr.mxu1 %v2640_v53 }
 0x935   :  { %v2177_v57 = vpop.xlane.xlu1 %2176 }
 0x936   :  { %v2179_v58 = vmul.f32 0.032258064, %v2177_v57 }
 0x937   :  { %v2174_v59 = vpop.xlane.xlu0 %2173 }
 0x938   :  { %5425 = vrsqrt.f32 %v2179_v58  ;;  %v2178_v60 = vmul.f32 0.032258064, %v2174_v59  ;;  %vm2189_vm7 = vcmp.eq.f32.partialorder %v2179_v58, inf  ;;  %v2192_v0 = vand.u32 2147483648, %v2179_v58 }
 0x939   :  { %vm2191_vm8 = vcmp.eq.f32.partialorder %v2179_v58, 0.0 }
 0x93a   :  { %5427 = vrsqrt.f32 %v2178_v60  ;;  %vm2182_vm9 = vcmp.eq.f32.partialorder %v2178_v60, inf  ;;  %v2185_v5 = vand.u32 2147483648, %v2178_v60  ;;  %vm2184_vm10 = vcmp.eq.f32.partialorder %v2178_v60, 0.0 }
 0x945   :  { %v5426_v62 = vpop.eup %5425 }
 0x946   :  { %v2188_v63 = vmul.f32 %v5426_v62, %v2179_v58  ;;  %v2638_v62 = vld [vmem:[%s6413_s1 + $0x228] sm:$0xff] }
 0x947   :  { %v5428_v2 = vpop.eup %5427 }
 0x948   :  { %v2190_v3 = vsel %vm2189_vm7, %v2179_v58, %v2188_v63  ;;  %v2181_v61 = vmul.f32 %v5428_v2, %v2178_v60 }
 0x949   :  { %v2193_v4 = vsel %vm2191_vm8, %v2192_v0, %v2190_v3  ;;  %v2637_v0 = vld [vmem:[%s6413_s1 + $0x220] sm:$0xff] }
 0x94a   :  { %v2196_v41 = vadd.f32 1e-06, %v2193_v4  ;;  %v2183_v6 = vsel %vm2182_vm9, %v2178_v60, %v2181_v61  ;;  %v2639_v60 = vld [vmem:[%s6413_s1 + $0x230] sm:$0xff] }
 0x94b   :  { %v2186_v7 = vsel %vm2184_vm10, %v2185_v5, %v2183_v6  ;;  %v2560_v4 = vld [vmem:[%s6414_s2 + $0xd0] sm:$0xff]  ;;  %v2393_v5 = vld [vmem:[%s6414_s2 + $0x148] sm:$0xff] }
 0x94c   :  { %5429 = vrcp.f32 %v2196_v41  ;;  %v2195_v8 = vadd.f32 1e-06, %v2186_v7  ;;  %v3380_v6 = vld [vmem:[%s6413_s1 + $0x2f0] sm:$0xff]  ;;  %v2392_v7 = vld [vmem:[%s6414_s2 + $0x140] sm:$0xff] }
 0x94e   :  { %5431 = vrcp.f32 %v2195_v8  ;;  %v3379_v8 = vld [vmem:[%s6413_s1 + $0x2e8] sm:$0xff] }
 0x959   :  { %v5430_v9 = vpop.eup %5429 }
 0x95a   :  { %v2200_v10 = vmul.f32 %v5430_v9, %v5937_v1  ;;  %v3048_v1 = vld [vmem:[%s6413_s1 + $0x2c0] sm:$0xff] }
 0x95b   :  { %v5432_v12 = vpop.eup %5431 }
 0x95c   :  { %v2199_v13 = vmul.f32 %v5432_v12, %v5940_v40  ;;  %v2206_v14 = vmul.f32 %v4621_v11, %v2200_v10  ;;  %v3218_v40 = vld [vmem:[%s6413_s1 + $0x1f0] sm:$0xff]  ;;  %v3378_v10 = vld [vmem:[%s6413_s1 + $0x2e0] sm:$0xff] }
 0x95e   :  { %v2205_v15 = vmul.f32 %v4621_v11, %v2199_v13  ;;  %v5999_v18 = vadd.f32 %v4622_v16, %v2206_v14  ;;  %v2642_v14 = vld [vmem:[%s6414_s2 + $0x118] sm:$0xff] }
 0x960   :  { %v5997_v17 = vadd.f32 %v4622_v16, %v2205_v15  ;;  %v2641_v16 = vld [vmem:[%s6414_s2 + $0x110] sm:$0xff] }
 0x962   :  { %5152 = vmatprep.mubr.msk.f32.mxu0 %vm23_vm0, %v5997_v17 }
 0x963   :  { %5153 = vmatmul.mubr.msk.f32.vlgmr.msra.gmra.mxu0 %vm23_vm0, %v5999_v18 }
 0x964   :  { %5167 = vmatpush3.msra.mxu0 %v2391_v32  ;;  %5174 = vmatprep.mubr.msk.f32.mxu0 %vm23_vm0, %v5957_v50  ;;  %v2219_v32 = vld [vmem:[%s6414_s2 + $0xc8] sm:$0xff] }
 0x965   :  { %5168 = vmatprep.subr.mxu0 %v2390_v19 }
 0x966   :  { %5169 = vmatpush3.msra.mxu0 %v2390_v19 }
 0x967   :  { %5170 = vmatprep.subr.mxu0 %v2389_v20 }
 0x968   :  { %5171 = vmatpush3.msra.mxu0 %v2389_v20 }
 0x969   :  { %5172 = vmatprep.subr.mxu0 %v2388_v21 }
 0x96a   :  { %5173 = vmatpush3.msra.mxu0 %v2388_v21  ;;  %v2561_v21 = vld [vmem:[%s6414_s2 + $0xd8] sm:$0xff] }
 0x96b   :  { %5175 = vmatmul.mubr.msk.f32.vlgmr.msra.gmra.mxu0 %vm23_vm0, %v5979_v48  ;;  %5184 = vmatprep.subr.mxu0 %v2559_v22 }
 0x96c   :  { %5185 = vmatpush3.msra.mxu0 %v2559_v22  ;;  %5192 = vmatprep.mubr.msk.f32.mxu0 %vm23_vm0, %v5997_v17  ;;  %v2970_v22 = vld [vmem:[%s6413_s1 + $0x258] sm:$0xff] }
 0x96d   :  { %5186 = vmatprep.subr.mxu0 %v2558_v23 }
 0x96e   :  { %5187 = vmatpush3.msra.mxu0 %v2558_v23 }
 0x96f   :  { %5188 = vmatprep.subr.mxu0 %v2557_v24 }
 0x970   :  { %5189 = vmatpush3.msra.mxu0 %v2557_v24 }
 0x971   :  { %5190 = vmatprep.subr.mxu0 %v2556_v25 }
 0x972   :  { %5191 = vmatpush3.msra.mxu0 %v2556_v25  ;;  %v2969_v25 = vld [vmem:[%s6413_s1 + $0x250] sm:$0xff] }
 0x973   :  { %5193 = vmatmul.mubr.msk.f32.vlgmr.msra.gmra.mxu0 %vm23_vm0, %v5999_v18  ;;  %5206 = vmatprep.subr.mxu0 %v2721_v26 }
 0x974   :  { %5207 = vmatpush3.msra.mxu0 %v2721_v26  ;;  %5214 = vmatprep.mubr.msk.f32.mxu0 %vm23_vm0, %v5957_v50 }
 0x975   :  { %5208 = vmatprep.subr.mxu0 %v2720_v27 }
 0x976   :  { %5209 = vmatpush3.msra.mxu0 %v2720_v27  ;;  %v2968_v27 = vld [vmem:[%s6413_s1 + $0x248] sm:$0xff] }
 0x977   :  { %5210 = vmatprep.subr.mxu0 %v2719_v29 }
 0x978   :  { %5211 = vmatpush3.msra.mxu0 %v2719_v29  ;;  %v2967_v29 = vld [vmem:[%s6413_s1 + $0x240] sm:$0xff] }
 0x979   :  { %5212 = vmatprep.subr.mxu0 %v2718_v30 }
 0x97a   :  { %5213 = vmatpush3.msra.mxu0 %v2718_v30 }
 0x97b   :  { %5215 = vmatmul.mubr.msk.f32.vlgmr.msra.gmra.mxu0 %vm23_vm0, %v5979_v48  ;;  %5224 = vmatprep.subr.mxu0 %v2889_v28 }
 0x97c   :  { %5225 = vmatpush3.msra.mxu0 %v2889_v28  ;;  %5232 = vmatprep.mubr.msk.f32.mxu0 %vm23_vm0, %v5997_v17  ;;  %v2890_v28 = vld [vmem:[%s6414_s2 + $0xe0] sm:$0xff] }
 0x97d   :  { %5226 = vmatprep.subr.mxu0 %v2888_v33 }
 0x97e   :  { %5227 = vmatpush3.msra.mxu0 %v2888_v33 }
 0x97f   :  { %5228 = vmatprep.subr.mxu0 %v2887_v35 }
 0x980   :  { %5229 = vmatpush3.msra.mxu0 %v2887_v35  ;;  %v6203_v35 = vld [vmem:[%s6412_s0 + $0x38] sm:$0xff] }
 0x981   :  { %5230 = vmatprep.subr.mxu0 %v2886_v36 }
 0x982   :  { %5231 = vmatpush3.msra.mxu0 %v2886_v36 }
 0x983   :  { %5233 = vmatmul.mubr.msk.f32.vlgmr.msra.gmra.mxu0 %vm23_vm0, %v5999_v18  ;;  %5246 = vmatprep.subr.mxu0 %v3051_v37 }
 0x984   :  { %5247 = vmatpush3.msra.mxu0 %v3051_v37  ;;  %5254 = vmatprep.mubr.msk.f32.mxu0 %vm23_vm0, %v5957_v50 }
 0x985   :  { %5248 = vmatprep.subr.mxu0 %v3050_v38 }
 0x986   :  { %5249 = vmatpush3.msra.mxu0 %v3050_v38  ;;  %v6209_v38 = vld [vmem:[%s6412_s0 + $0x30] sm:$0xff] }
 0x987   :  { %5250 = vmatprep.subr.mxu0 %v3049_v39 }
 0x988   :  { %5251 = vmatpush3.msra.mxu0 %v3049_v39 }
 0x989   :  { %5252 = vmatprep.subr.mxu0 %v3048_v1 }
 0x98a   :  { %5253 = vmatpush3.msra.mxu0 %v3048_v1 }
 0x98b   :  { %5255 = vmatmul.mubr.msk.f32.vlgmr.msra.gmra.mxu0 %vm23_vm0, %v5979_v48  ;;  %5264 = vmatprep.subr.mxu0 %v3219_v45 }
 0x98c   :  { %5265 = vmatpush3.msra.mxu0 %v3219_v45  ;;  %5272 = vmatprep.mubr.msk.f32.mxu0 %vm23_vm0, %v5997_v17 }
 0x98d   :  { %5266 = vmatprep.subr.mxu0 %v3218_v40 }
 0x98e   :  { %5267 = vmatpush3.msra.mxu0 %v3218_v40 }
 0x98f   :  { %5268 = vmatprep.subr.mxu0 %v3217_v43 }
 0x990   :  { %5269 = vmatpush3.msra.mxu0 %v3217_v43  ;;  %v2972_v43 = vld [vmem:[%s6414_s2 + $0x128] sm:$0xff] }
 0x991   :  { %5270 = vmatprep.subr.mxu0 %v3216_v42 }
 0x992   :  { %5271 = vmatpush3.msra.mxu0 %v3216_v42 }
 0x993   :  { %5273 = vmatmul.mubr.msk.f32.vlgmr.msra.gmra.mxu0 %vm23_vm0, %v5999_v18  ;;  %5286 = vmatprep.subr.mxu0 %v3381_v54 }
 0x994   :  { %5294 = vmatprep.mubr.msk.f32.mxu0 %vm23_vm0, %v5957_v50  ;;  %5287 = vmatpush3.msra.mxu0 %v3381_v54 }
 0x995   :  { %5288 = vmatprep.subr.mxu0 %v3380_v6 }
 0x996   :  { %5289 = vmatpush3.msra.mxu0 %v3380_v6 }
 0x997   :  { %5290 = vmatprep.subr.mxu0 %v3379_v8 }
 0x998   :  { %5291 = vmatpush3.msra.mxu0 %v3379_v8 }
 0x999   :  { %5292 = vmatprep.subr.mxu0 %v3378_v10 }
 0x99a   :  { %5293 = vmatpush3.msra.mxu0 %v3378_v10 }
 0x99b   :  { %5295 = vmatmul.mubr.msk.f32.vlgmr.msra.gmra.mxu0 %vm23_vm0, %v5979_v48 }
 0xa23   :  { %v5154_v55 = vpop.f32.mrf.mxu0 }
 0xa24   :  { %v2298_v59 = vadd.f32 %v5154_v55, %v2219_v32 }
 0xa25   :  { %v2292_v57 = vpop.f32.mrf.mxu0 }
 0xa26   :  { %v2293_v58 = vadd.f32 %v2292_v57, %v2218_v56  ;;  %v3299_v56 = vld [vmem:[%s6413_s1 + $0x270] sm:$0xff]  ;;  %v3298_v57 = vld [vmem:[%s6413_s1 + $0x268] sm:$0xff] }
 0xa28   :  { %5181 = vmatprep.mubr.msk.f32.mxu1 %vm328_vm5, %v2293_v58  ;;  %v3297_v58 = vld [vmem:[%s6413_s1 + $0x260] sm:$0xff] }
 0xa29   :  { %5182 = vmatmul.mubr.msk.f32.vlgmr.msra.gmra.mxu1 %vm328_vm5, %v2298_v59 }
 0xa2a   :  { %5196 = vmatpush3.msra.mxu1 %v2640_v53  ;;  %5203 = vmatprep.mubr.msk.f32.mxu1 %vm23_vm0, %v5957_v50  ;;  %v3300_v53 = vld [vmem:[%s6413_s1 + $0x278] sm:$0xff] }
 0xa2b   :  { %5197 = vmatprep.subr.mxu1 %v2639_v60  ;;  %v5176_v63 = vpop.f32.mrf.mxu0 }
 0xa2c   :  { %5198 = vmatpush3.msra.mxu1 %v2639_v60  ;;  %v2466_v9 = vadd.f32 %v5176_v63, %v2393_v5  ;;  %v3220_v60 = vld [vmem:[%s6414_s2 + $0xf0] sm:$0xff] }
 0xa2d   :  { %5199 = vmatprep.subr.mxu1 %v2638_v62  ;;  %v2460_v2 = vpop.f32.mrf.mxu0 }
 0xa2e   :  { %5200 = vmatpush3.msra.mxu1 %v2638_v62  ;;  %v2461_v11 = vadd.f32 %v2460_v2, %v2392_v7  ;;  %5304 = vmatprep.subr.mxu0 %v2466_v9 }
 0xa2f   :  { %5201 = vmatprep.subr.mxu1 %v2637_v0  ;;  %5305 = vmatpush3.msra.mxu0 %v2466_v9 }
 0xa30   :  { %5202 = vmatpush3.msra.mxu1 %v2637_v0  ;;  %5306 = vmatprep.subr.mxu0 %v2461_v11 }
 0xa31   :  { %5204 = vmatmul.mubr.msk.f32.vlgmr.msra.gmra.mxu1 %vm23_vm0, %v5979_v48  ;;  %5307 = vmatpush3.msra.mxu0 %v2461_v11 }
 0xa33   :  { %v5194_v3 = vpop.f32.mrf.mxu0 }
 0xa34   :  { %v2634_v24 = vadd.f32 %v5194_v3, %v2561_v21 }
 0xa35   :  { %v2628_v61 = vpop.f32.mrf.mxu0 }
 0xa36   :  { %v2629_v41 = vadd.f32 %v2628_v61, %v2560_v4 }
 0xa38   :  { %5221 = vmatprep.mubr.msk.f32.mxu1 %vm328_vm5, %v2629_v41 }
 0xa3b   :  { %v6168_v19 = vpop.f32.mrf.mxu0 }
 0xa3d   :  { %v6179_v23 = vpop.f32.mrf.mxu0 }
 0xa43   :  { %v5234_v26 = vpop.f32.mrf.mxu0 }
 0xa44   :  { %v2964_v55 = vadd.f32 %v5234_v26, %v2891_v52 }
 0xa45   :  { %v2958_v30 = vpop.f32.mrf.mxu0 }
 0xa46   :  { %v2959_v33 = vadd.f32 %v2958_v30, %v2890_v28 }
 0xa4b   :  { %v6220_v49 = vpop.f32.mrf.mxu0 }
 0xa4d   :  { %v6231_v54 = vpop.f32.mrf.mxu0 }
 0xa53   :  { %v5274_v32 = vpop.f32.mrf.mxu0 }
 0xa55   :  { %v3288_v59 = vpop.f32.mrf.mxu0 }
 0xa56   :  { %v3289_v62 = vadd.f32 %v3288_v59, %v3220_v60 }
 0xae9   :  { %v6158_v12 = vpop.f32.mrf.mxu1 }
 0xaea   :  { %v2553_v41 = vadd.f32 %v6158_v12, %v6203_v35 }
 0xaeb   :  { %v6160_v13 = vpop.f32.mrf.mxu1 }
 0xaec   :  { %v3549_v8 = vsel %vm1406_vm6, %v2553_v41, -inf }
 0xaf1   :  { %v5205_v15 = vpop.f32.mrf.mxu1 }
 0xaf2   :  { %v2715_v17 = vadd.f32 %v5205_v15, %v2642_v14 }
 0xaf3   :  { %v2709_v18 = vpop.f32.mrf.mxu1 }
 0xaf4   :  { %v2710_v20 = vadd.f32 %v2709_v18, %v2641_v16  ;;  %5217 = vmatprep.subr.msk.mxu1 %vm328_vm5, %v2715_v17  ;;  %v3302_v16 = vld [vmem:[%s6414_s2 + $0x138] sm:$0xff]  ;;  %v3301_v18 = vld [vmem:[%s6414_s2 + $0x130] sm:$0xff] }
 0xaf5   :  { %5218 = vmatpush3.xpose.msk.msra.mxu1 %vm328_vm5, %v2715_v17 }
 0xaf6   :  { %5219 = vmatprep.subr.msk.mxu1 %vm328_vm5, %v2710_v20 }
 0xaf9   :  { %5220 = vmatpush3.xpose.msk.msra.mxu1 %vm328_vm5, %v2710_v20 }
 0xafa   :  { %5235 = vmatprep.subr.mxu1 %v2970_v22 }
 0xafc   :  { %5222 = vmatmul.mubr.msk.f32.vlgmr.msra.gmra.mxu1 %vm328_vm5, %v2634_v24  ;;  %v2723_v24 = vld [vmem:[%s6414_s2 + $0x158] sm:$0xff] }
 0xafd   :  { %5236 = vmatpush3.msra.mxu1 %v2970_v22  ;;  %5243 = vmatprep.mubr.msk.f32.mxu1 %vm23_vm0, %v5957_v50  ;;  %v2796_v26 = vadd.f32 %v6168_v19, %v2723_v24 }
 0xafe   :  { %5237 = vmatprep.subr.mxu1 %v2969_v25 }
 0xaff   :  { %5238 = vmatpush3.msra.mxu1 %v2969_v25  ;;  %v3221_v25 = vld [vmem:[%s6414_s2 + $0xf8] sm:$0xff] }
 0xb00   :  { %5239 = vmatprep.subr.mxu1 %v2968_v27 }
 0xb01   :  { %5240 = vmatpush3.msra.mxu1 %v2968_v27  ;;  %v2722_v27 = vld [vmem:[%s6414_s2 + $0x150] sm:$0xff] }
 0xb02   :  { %5241 = vmatprep.subr.mxu1 %v2967_v29  ;;  %v2791_v30 = vadd.f32 %v6179_v23, %v2722_v27 }
 0xb03   :  { %5242 = vmatpush3.msra.mxu1 %v2967_v29  ;;  %v3294_v29 = vadd.f32 %v5274_v32, %v3221_v25 }
 0xb04   :  { %5244 = vmatmul.mubr.msk.f32.vlgmr.msra.gmra.mxu1 %vm23_vm0, %v5979_v48 }
 0xb05   :  { %5261 = vmatprep.mubr.msk.f32.mxu1 %vm328_vm5, %v2959_v33 }
 0xbbc   :  { %v5223_v36 = vpop.f32.mrf.mxu1 }
 0xbbd   :  { %v2883_v37 = vadd.f32 %v5223_v36, %v6203_v35 }
 0xbbe   :  { %v2877_v39 = vpop.f32.mrf.mxu1 }
 0xbbf   :  { %v2878_v1 = vadd.f32 %v2877_v39, %v6209_v38  ;;  %v3555_v45 = vsel %vm1406_vm6, %v2883_v37, -inf }
 0xbc0   :  { %3556 = vmax.xlane.f32.xlu1 %v3555_v45 }
 0xbc1   :  { %v3552_v40 = vsel %vm1406_vm6, %v2878_v1, -inf }
 0xbc2   :  { %3553 = vmax.xlane.f32.xlu0 %v3552_v40 }
 0xbc4   :  { %v5245_v42 = vpop.f32.mrf.mxu1 }
 0xbc5   :  { %v3045_v46 = vadd.f32 %v5245_v42, %v2972_v43 }
 0xbc6   :  { %v3039_v47 = vpop.f32.mrf.mxu1 }
 0xbc7   :  { %v3040_v51 = vadd.f32 %v3039_v47, %v2971_v44  ;;  %5257 = vmatprep.subr.msk.mxu1 %vm328_vm5, %v3045_v46 }
 0xbc8   :  { %5258 = vmatpush3.xpose.msk.msra.mxu1 %vm328_vm5, %v3045_v46 }
 0xbc9   :  { %5259 = vmatprep.subr.msk.mxu1 %vm328_vm5, %v3040_v51 }
 0xbcc   :  { %5260 = vmatpush3.xpose.msk.msra.mxu1 %vm328_vm5, %v3040_v51 }
 0xbcd   :  { %5275 = vmatprep.subr.mxu1 %v3300_v53 }
 0xbcf   :  { %5262 = vmatmul.mubr.msk.f32.vlgmr.msra.gmra.mxu1 %vm328_vm5, %v2964_v55 }
 0xbd0   :  { %5276 = vmatpush3.msra.mxu1 %v3300_v53  ;;  %5283 = vmatprep.mubr.msk.f32.mxu1 %vm23_vm0, %v5957_v50 }
 0xbd1   :  { %5277 = vmatprep.subr.mxu1 %v3299_v56 }
 0xbd2   :  { %5278 = vmatpush3.msra.mxu1 %v3299_v56 }
 0xbd3   :  { %5279 = vmatprep.subr.mxu1 %v3298_v57 }
 0xbd4   :  { %5280 = vmatpush3.msra.mxu1 %v3298_v57 }
 0xbd5   :  { %5281 = vmatprep.subr.mxu1 %v3297_v58 }
 0xbd6   :  { %5282 = vmatpush3.msra.mxu1 %v3297_v58 }
 0xbd7   :  { %5284 = vmatmul.mubr.msk.f32.vlgmr.msra.gmra.mxu1 %vm23_vm0, %v5979_v48  ;;  %v2548_v48 = vadd.f32 %v6160_v13, %v6209_v38 }
 0xbd8   :  { %5301 = vmatprep.mubr.msk.f32.mxu1 %vm328_vm5, %v3289_v62 }
 0xbd9   :  { %v3546_v9 = vsel %vm1406_vm6, %v2548_v48, -inf }
 0xc49   :  { %v3557_v50 = vpop.xlane.xlu1 %3556 }
 0xc4a   :  { %v3573_v63 = vsub.f32 %v2883_v37, %v3557_v50 }
 0xc4b   :  { %v3554_v0 = vpop.xlane.xlu0 %3553 }
 0xc4c   :  { %v3584_v2 = vmul.f32 1.442695, %v3573_v63  ;;  %v3572_v3 = vsub.f32 %v2878_v1, %v3554_v0 }
 0xc4e   :  { %5433 = vpow2.f32 %v3584_v2  ;;  %v3582_v4 = vmul.f32 1.442695, %v3572_v3  ;;  %v3797_v3 = vld [vmem:[%s6413_s1 + $0x328] sm:$0xff] }
 0xc4f   :  { %5318 = vmatprep.subr.mxu0 %v3797_v3 }
 0xc50   :  { %5435 = vpow2.f32 %v3582_v4 }
 0xc5b   :  { %v5434_v61 = vpop.eup %5433 }
 0xc5c   :  { %v3603_v5 = vsel %vm1406_vm6, %v5434_v61, 0.0 }
 0xc5d   :  { %v5436_v6 = vpop.eup %5435  ;;  %3604 = vadd.xlane.f32.xlu1 %v3603_v5 }
 0xc5e   :  { %v3600_v7 = vsel %vm1406_vm6, %v5436_v6, 0.0 }
 0xc5f   :  { %3601 = vadd.xlane.f32.xlu0 %v3600_v7 }
 0xc61   :  { %3550 = vmax.xlane.f32.xlu1 %v3549_v8 }
 0xc63   :  { %3547 = vmax.xlane.f32.xlu0 %v3546_v9 }
 0xc8f   :  { %v5263_v10 = vpop.f32.mrf.mxu1 }
 0xc90   :  { %v3213_v11 = vadd.f32 %v5263_v10, %v6203_v35 }
 0xc91   :  { %v3207_v12 = vpop.f32.mrf.mxu1 }
 0xc92   :  { %v3208_v14 = vadd.f32 %v3207_v12, %v6209_v38  ;;  %v3561_v15 = vsel %vm1406_vm6, %v3213_v11, -inf }
 0xc93   :  { %3562 = vmax.xlane.f32.xlu1 %v3561_v15 }
 0xc94   :  { %v3558_v13 = vsel %vm1406_vm6, %v3208_v14, -inf }
 0xc95   :  { %3559 = vmax.xlane.f32.xlu0 %v3558_v13 }
 0xc97   :  { %v5285_v17 = vpop.f32.mrf.mxu1 }
 0xc98   :  { %v3375_v20 = vadd.f32 %v5285_v17, %v3302_v16 }
 0xc99   :  { %v3369_v21 = vpop.f32.mrf.mxu1 }
 0xc9a   :  { %v3370_v22 = vadd.f32 %v3369_v21, %v3301_v18  ;;  %5297 = vmatprep.subr.msk.mxu1 %vm328_vm5, %v3375_v20  ;;  %v3053_v18 = vld [vmem:[%s6414_s2 + $0x168] sm:$0xff] }
 0xc9b   :  { %5298 = vmatpush3.xpose.msk.msra.mxu1 %vm328_vm5, %v3375_v20  ;;  %v3126_v24 = vadd.f32 %v6220_v49, %v3053_v18  ;;  %v4355_v18 = vld [vmem:[%s6413_s1 + $0x350] sm:$0xff] }
 0xc9c   :  { %5299 = vmatprep.subr.msk.mxu1 %vm328_vm5, %v3370_v22 }
 0xc9f   :  { %5300 = vmatpush3.xpose.msk.msra.mxu1 %vm328_vm5, %v3370_v22 }
 0xca0   :  { %5311 = vmatprep.subr.mxu1 %v2796_v26 }
 0xca2   :  { %5302 = vmatmul.mubr.msk.f32.vlgmr.msra.gmra.mxu1 %vm328_vm5, %v3294_v29 }
 0xca3   :  { %5312 = vmatpush3.msra.mxu1 %v2796_v26  ;;  %v3052_v26 = vld [vmem:[%s6414_s2 + $0x160] sm:$0xff] }
 0xca4   :  { %5313 = vmatprep.subr.mxu1 %v2791_v30 }
 0xca5   :  { %5314 = vmatpush3.msra.mxu1 %v2791_v30  ;;  %v3121_v30 = vadd.f32 %v6231_v54, %v3052_v26  ;;  %v4449_v26 = vld [vmem:[%s6413_s1 + $0x380] sm:$0xff] }
 0xce6   :  { %v3605_v28 = vpop.xlane.xlu1 %3604 }
 0xce7   :  { %5437 = vrcp.f32 %v3605_v28  ;;  %v3383_v28 = vld [vmem:[%s6414_s2 + $0x178] sm:$0xff] }
 0xce8   :  { %v3602_v33 = vpop.xlane.xlu0 %3601 }
 0xce9   :  { %5439 = vrcp.f32 %v3602_v33  ;;  %v5296_v33 = vpop.f32.mrf.mxu0 }
 0xcea   :  { %v3551_v1 = vpop.xlane.xlu1 %3550  ;;  %v3456_v54 = vadd.f32 %v5296_v33, %v3383_v28 }
 0xceb   :  { %v3571_v23 = vsub.f32 %v2553_v41, %v3551_v1  ;;  %v4041_v1 = vld [vmem:[%s6413_s1 + $0x330] sm:$0xff] }
 0xcec   :  { %v3548_v45 = vpop.xlane.xlu0 %3547 }
 0xced   :  { %v3570_v43 = vsub.f32 %v2548_v48, %v3548_v45  ;;  %v3580_v44 = vmul.f32 1.442695, %v3571_v23 }
 0xcef   :  { %v3578_v47 = vmul.f32 1.442695, %v3570_v43  ;;  %5441 = vpow2.f32 %v3580_v44 }
 0xcf1   :  { %5443 = vpow2.f32 %v3578_v47 }
 0xcf4   :  { %v5438_v19 = vpop.eup %5437 }
 0xcf5   :  { %v3629_v39 = vmul.f32 %v5438_v19, %v5434_v61  ;;  %v3382_v19 = vld [vmem:[%s6414_s2 + $0x170] sm:$0xff] }
 0xcf6   :  { %v5440_v36 = vpop.eup %5439 }
 0xcf7   :  { %v3628_v37 = vmul.f32 %v5440_v36, %v5436_v6  ;;  %v3450_v36 = vpop.f32.mrf.mxu0 }
 0xcf9   :  { %5315 = vmatprep.mubr.msk.f32.mxu1 %vm1406_vm6, %v3628_v37  ;;  %v3451_v37 = vadd.f32 %v3450_v36, %v3382_v19 }
 0xcfa   :  { %5316 = vmatmul.mubr.msk.f32.vlgmr.msra.gmra.mxu1 %vm1406_vm6, %v3629_v39  ;;  %v3715_v39 = vld [vmem:[%s6413_s1 + $0x320] sm:$0xff] }
 0xcfb   :  { %5323 = vmatprep.subr.mxu1 %v3715_v39 }
 0xcfc   :  { %v5442_v59 = vpop.eup %5441  ;;  %5324 = vmatpush3.msra.mxu1 %v3715_v39 }
 0xcfd   :  { %v3597_v50 = vsel %vm1406_vm6, %v5442_v59, 0.0  ;;  %5335 = vmatprep.subr.mxu1 %v4041_v1 }
 0xcfe   :  { %v5444_v62 = vpop.eup %5443 }
 0xcff   :  { %v3594_v0 = vsel %vm1406_vm6, %v5444_v62, 0.0 }
 0xd1c   :  { %v3563_v40 = vpop.xlane.xlu1 %3562 }
 0xd1d   :  { %v3575_v46 = vsub.f32 %v3213_v11, %v3563_v40 }
 0xd1e   :  { %v3560_v42 = vpop.xlane.xlu0 %3559 }
 0xd1f   :  { %v3574_v51 = vsub.f32 %v3208_v14, %v3560_v42  ;;  %v3588_v52 = vmul.f32 1.442695, %v3575_v46 }
 0xd21   :  { %v3586_v53 = vmul.f32 1.442695, %v3574_v51  ;;  %5445 = vpow2.f32 %v3588_v52  ;;  %v4206_v51 = vld [vmem:[%s6413_s1 + $0x338] sm:$0xff] }
 0xd23   :  { %5447 = vpow2.f32 %v3586_v53 }
 0xd2e   :  { %v5446_v63 = vpop.eup %5445 }
 0xd30   :  { %v5448_v2 = vpop.eup %5447 }
 0xd62   :  { %v5303_v55 = vpop.f32.mrf.mxu1 }
 0xd63   :  { %v3543_v56 = vadd.f32 %v5303_v55, %v6203_v35  ;;  %v3609_v35 = vsel %vm1406_vm6, %v5446_v63, 0.0 }
 0xd64   :  { %v3537_v32 = vpop.f32.mrf.mxu1 }
 0xd65   :  { %v3538_v57 = vadd.f32 %v3537_v32, %v6209_v38  ;;  %v3567_v58 = vsel %vm1406_vm6, %v3543_v56, -inf  ;;  %v3606_v38 = vsel %vm1406_vm6, %v5448_v2, 0.0 }
 0xd66   :  { %3568 = vmax.xlane.f32.xlu1 %v3567_v58 }
 0xd67   :  { %v3564_v60 = vsel %vm1406_vm6, %v3538_v57, -inf }
 0xd68   :  { %3565 = vmax.xlane.f32.xlu0 %v3564_v60 }
 0xd6a   :  { %3598 = vadd.xlane.f32.xlu1 %v3597_v50 }
 0xd6c   :  { %3595 = vadd.xlane.f32.xlu0 %v3594_v0 }
 0xd6e   :  { %3610 = vadd.xlane.f32.xlu1 %v3609_v35  ;;  %v4679_v35 = vld [vmem:[%s6414_s2 + $0x188] ss:$0 sm:$0xff] }
 0xd70   :  { %3607 = vadd.xlane.f32.xlu0 %v3606_v38 }
 0xdba   :  { %v5317_v16 = vpop.f32.mrf.mxu1 }
 0xdbc   :  { %v3788_v25 = vpop.f32.mrf.mxu1 }
 0xdef   :  { %v3569_v4 = vpop.xlane.xlu1 %3568 }
 0xdf0   :  { %v3577_v61 = vsub.f32 %v3543_v56, %v3569_v4 }
 0xdf1   :  { %v3566_v41 = vpop.xlane.xlu0 %3565 }
 0xdf2   :  { %v3592_v5 = vmul.f32 1.442695, %v3577_v61  ;;  %v3576_v6 = vsub.f32 %v3538_v57, %v3566_v41 }
 0xdf3   :  { %v3599_v48 = vpop.xlane.xlu1 %3598 }
 0xdf4   :  { %5449 = vpow2.f32 %v3592_v5  ;;  %v3590_v7 = vmul.f32 1.442695, %v3576_v6 }
 0xdf5   :  { %5451 = vrcp.f32 %v3599_v48  ;;  %v3596_v8 = vpop.xlane.xlu0 %3595 }
 0xdf6   :  { %5453 = vpow2.f32 %v3590_v7 }
 0xdf7   :  { %5455 = vrcp.f32 %v3596_v8  ;;  %v3611_v10 = vpop.xlane.xlu1 %3610 }
 0xdf9   :  { %v3608_v9 = vpop.xlane.xlu0 %3607 }
 0xdfa   :  { %5457 = vrcp.f32 %v3608_v9 }
 0xdfb   :  { %5459 = vrcp.f32 %v3611_v10 }
 0xe01   :  { %v5450_v11 = vpop.eup %5449 }
 0xe02   :  { %v5452_v12 = vpop.eup %5451  ;;  %v3615_v14 = vsel %vm1406_vm6, %v5450_v11, 0.0 }
 0xe03   :  { %v5454_v15 = vpop.eup %5453  ;;  %3616 = vadd.xlane.f32.xlu1 %v3615_v14  ;;  %v3627_v21 = vmul.f32 %v5452_v12, %v5442_v59 }
 0xe04   :  { %v5456_v13 = vpop.eup %5455  ;;  %v3612_v17 = vsel %vm1406_vm6, %v5454_v15, 0.0 }
 0xe05   :  { %3613 = vadd.xlane.f32.xlu0 %v3612_v17  ;;  %v3626_v20 = vmul.f32 %v5456_v13, %v5444_v62  ;;  %v4356_v17 = vld [vmem:[%s6413_s1 + $0x358] sm:$0xff] }
 0xe07   :  { %5308 = vmatprep.mubr.msk.f32.mxu0 %vm1406_vm6, %v3626_v20  ;;  %v5458_v22 = vpop.eup %5457  ;;  %v4354_v20 = vld [vmem:[%s6413_s1 + $0x348] sm:$0xff] }
 0xe08   :  { %5309 = vmatmul.mubr.msk.f32.vlgmr.msra.gmra.mxu0 %vm1406_vm6, %v3627_v21  ;;  %v5460_v27 = vpop.eup %5459  ;;  %v3630_v29 = vmul.f32 %v5458_v22, %v5448_v2  ;;  %v4353_v21 = vld [vmem:[%s6413_s1 + $0x340] sm:$0xff]  ;;  %v4452_v22 = vld [vmem:[%s6413_s1 + $0x398] sm:$0xff] }
 0xe09   :  { %5319 = vmatpush3.msra.mxu0 %v3797_v3  ;;  %5320 = vmatprep.mubr.msk.f32.mxu0 %vm328_vm5, %v3788_v25  ;;  %v3631_v49 = vmul.f32 %v5460_v27, %v5446_v63  ;;  %v4450_v25 = vld [vmem:[%s6413_s1 + $0x388] sm:$0xff] }
 0xe0a   :  { %5328 = vmatprep.subr.mxu0 %v3126_v24 }
 0xe0c   :  { %5321 = vmatmul.mubr.msk.f32.vlgmr.msra.gmra.mxu0 %vm328_vm5, %v5317_v16 }
 0xe0d   :  { %5329 = vmatpush3.msra.mxu0 %v3126_v24  ;;  %5332 = vmatprep.mubr.msk.f32.mxu0 %vm1406_vm6, %v3630_v29  ;;  %v4451_v24 = vld [vmem:[%s6413_s1 + $0x390] sm:$0xff] }
 0xe0e   :  { %5330 = vmatprep.subr.mxu0 %v3121_v30 }
 0xe0f   :  { %5331 = vmatpush3.msra.mxu0 %v3121_v30 }
 0xe10   :  { %5333 = vmatmul.mubr.msk.f32.vlgmr.msra.gmra.mxu0 %vm1406_vm6, %v3631_v49  ;;  %5340 = vmatprep.subr.mxu0 %v3456_v54 }
 0xe11   :  { %5341 = vmatpush3.msra.mxu0 %v3456_v54 }
 0xe12   :  { %5342 = vmatprep.subr.mxu0 %v3451_v37 }
 0xe13   :  { %5343 = vmatpush3.msra.mxu0 %v3451_v37 }
 0xe14   :  { %5352 = vmatprep.subr.mxu0 %v4356_v17 }
 0xe8c   :  { %v3617_v45 = vpop.xlane.xlu1 %3616 }
 0xe8d   :  { %5461 = vrcp.f32 %v3617_v45 }
 0xe8e   :  { %v3614_v23 = vpop.xlane.xlu0 %3613 }
 0xe8f   :  { %5463 = vrcp.f32 %v3614_v23 }
 0xe9a   :  { %v5462_v40 = vpop.eup %5461 }
 0xe9b   :  { %v3633_v44 = vmul.f32 %v5462_v40, %v5450_v11 }
 0xe9c   :  { %v5464_v43 = vpop.eup %5463 }
 0xe9d   :  { %v3632_v42 = vmul.f32 %v5464_v43, %v5454_v15 }
 0xe9f   :  { %5344 = vmatprep.mubr.msk.f32.mxu0 %vm1406_vm6, %v3632_v42 }
 0xea0   :  { %5345 = vmatmul.mubr.msk.f32.vlgmr.msra.gmra.mxu0 %vm1406_vm6, %v3633_v44 }
 0xea1   :  { %5353 = vmatpush3.msra.mxu0 %v4356_v17 }
 0xea2   :  { %5354 = vmatprep.subr.mxu0 %v4355_v18 }
 0xea3   :  { %5355 = vmatpush3.msra.mxu0 %v4355_v18 }
 0xea4   :  { %5356 = vmatprep.subr.mxu0 %v4354_v20 }
 0xea5   :  { %5357 = vmatpush3.msra.mxu0 %v4354_v20 }
 0xea6   :  { %5358 = vmatprep.subr.mxu0 %v4353_v21 }
 0xea7   :  { %5359 = vmatpush3.msra.mxu0 %v4353_v21 }
 0xec8   :  { %v5310_v46 = vpop.f32.mrf.mxu0 }
 0xeca   :  { %v3706_v47 = vpop.f32.mrf.mxu0 }
 0xecb   :  { %5325 = vmatprep.mubr.msk.f32.mxu1 %vm328_vm5, %v3706_v47 }
 0xecc   :  { %v5322_v52 = vpop.f32.mrf.mxu0  ;;  %5326 = vmatmul.mubr.msk.f32.vlgmr.msra.gmra.mxu1 %vm328_vm5, %v5310_v46  ;;  %v4680_v46 = vld [vmem:[%s6414_s2 + $0x1c0] ss:$0 sm:$0xff] }
 0xecd   :  { %5336 = vmatpush3.msra.mxu1 %v4041_v1 }
 0xece   :  { %v3870_v53 = vpop.f32.mrf.mxu0  ;;  %5347 = vmatprep.subr.mxu1 %v4206_v51 }
 0xed0   :  { %v5334_v55 = vpop.f32.mrf.mxu0 }
 0xed2   :  { %v4032_v56 = vpop.f32.mrf.mxu0 }
 0xed3   :  { %5337 = vmatprep.mubr.msk.f32.mxu1 %vm328_vm5, %v4032_v56 }
 0xed4   :  { %5338 = vmatmul.mubr.msk.f32.vlgmr.msra.gmra.mxu1 %vm328_vm5, %v5334_v55  ;;  %v4681_v55 = vld [vmem:[%s6414_s2 + $0x1c8] ss:$0 sm:$0xff] }
 0xed5   :  { %5348 = vmatpush3.msra.mxu1 %v4206_v51 }
 0xed6   :  { %5363 = vmatprep.subr.mxu1 %v4452_v22 }
 0xf60   :  { %v5346_v32 = vpop.f32.mrf.mxu0 }
 0xf62   :  { %v4197_v57 = vpop.f32.mrf.mxu0 }
 0xf63   :  { %5349 = vmatprep.mubr.msk.f32.mxu1 %vm328_vm5, %v4197_v57  ;;  %v4448_v57 = vld [vmem:[%s6413_s1 + $0x378] sm:$0xff] }
 0xf64   :  { %5350 = vmatmul.mubr.msk.f32.vlgmr.msra.gmra.mxu1 %vm328_vm5, %v5346_v32 }
 0xf65   :  { %5364 = vmatpush3.msra.mxu1 %v4452_v22 }
 0xf66   :  { %5365 = vmatprep.subr.mxu1 %v4451_v24 }
 0xf67   :  { %5366 = vmatpush3.msra.mxu1 %v4451_v24 }
 0xf68   :  { %5367 = vmatprep.subr.mxu1 %v4450_v25 }
 0xf69   :  { %5368 = vmatpush3.msra.mxu1 %v4450_v25 }
 0xf6a   :  { %5369 = vmatprep.subr.mxu1 %v4449_v26 }
 0xf6b   :  { %5370 = vmatpush3.msra.mxu1 %v4449_v26 }
 0xf6c   :  { %5371 = vmatprep.subr.mxu1 %v4448_v57 }
 0xf6d   :  { %5372 = vmatpush3.msra.mxu1 %v4448_v57 }
 0xf8c   :  { %v5327_v58 = vpop.f32.mrf.mxu1 }
 0xf8d   :  { %v3957_v62 = vadd.f32 %v5327_v58, %v5322_v52  ;;  %v4447_v58 = vld [vmem:[%s6413_s1 + $0x370] sm:$0xff] }
 0xf8e   :  { %v3951_v59 = vpop.f32.mrf.mxu1  ;;  %5373 = vmatprep.subr.mxu1 %v4447_v58 }
 0xf8f   :  { %v3952_v63 = vadd.f32 %v3951_v59, %v3870_v53  ;;  %5374 = vmatpush3.msra.mxu1 %v4447_v58  ;;  %v4446_v59 = vld [vmem:[%s6413_s1 + $0x368] sm:$0xff] }
 0xf90   :  { %5375 = vmatprep.subr.mxu1 %v4446_v59 }
 0xf91   :  { %5376 = vmatpush3.msra.mxu1 %v4446_v59 }
 0xf94   :  { %v5339_v60 = vpop.f32.mrf.mxu1 }
 0xf95   :  { %v4124_v0 = vadd.f32 %v5339_v60, %v3957_v62  ;;  %v4445_v60 = vld [vmem:[%s6413_s1 + $0x360] sm:$0xff]  ;;  %v4682_v62 = vld [vmem:[%s6414_s2 + $0x190] ss:$0 sm:$0xff]  ;;  %s5496_s1 = smov [#allocation2]  }
 0xf96   :  { %v4114_v50 = vpop.f32.mrf.mxu1  ;;  %5377 = vmatprep.subr.mxu1 %v4445_v60  ;;  %s4551_s24 = sshll.u32 %s5496_s1, 4  ;;  %s4552_s24 = int_to_ptr.vmem [resolvable:$true] %s4551_s24 }
 0xf97   :  { %v4123_v38 = vadd.f32 %v4114_v50, %v3952_v63  ;;  %5378 = vmatpush3.msra.mxu1 %v4445_v60  ;;  %s5474_s25 = scalar_lea.vmem %s4552_s24, 256  ;;  %p5479_p1 = scmp.lt.s32.totalorder %s4552_s24, %s4552_s24 }
 0xf98   :  { %p5475_p0 = scmp.ne.s32.totalorder %s4552_s24, %s5474_s25  ;;  %p5480_p2 = scmp.lt.s32.totalorder %s5474_s25, %s5474_s25 }
 0xf9a   :  { %p5481_p3 = por %p5480_p2, %p5479_p1 }
 0xf9c   :  { %p5482_p4 = pnand %p5481_p3, %p5475_p0 }
0x1024   :  { %v5351_v2 = vpop.f32.mrf.mxu1 }
0x1025   :  { %v4289_v3 = vadd.f32 %v5351_v2, %v4124_v0 }
0x1026   :  { %v4279_v4 = vpop.f32.mrf.mxu1 }
0x1027   :  { %v4296_v61 = vadd.f32 %v4679_v35, %v4289_v3  ;;  %v4288_v41 = vadd.f32 %v4279_v4, %v4123_v38  ;;  %v4687_v4 = vld [vmem:[%s6414_s2 + $0x198] ss:$0 sm:$0xff] }
0x1029   :  { %v6342_v5 = vadd.f32 %v4296_v61, %v5925_v31  ;;  %v4295_v6 = vadd.f32 %v4679_v35, %v4288_v41 }
0x102b   :  { %v6345_v48 = vadd.f32 %v4295_v6, %v5930_v34  ;;  %v4302_v7 = vsel %vm23_vm0, %v6342_v5, 0.0 }
0x102c   :  { %4303 = vadd.xlane.f32.xlu1 %v4302_v7 }
0x102d   :  { %v4299_v8 = vsel %vm23_vm0, %v6345_v48, 0.0 }
0x102e   :  { %4300 = vadd.xlane.f32.xlu0 %v4299_v8 }
0x10b5   :  { %v4304_v9 = vpop.xlane.xlu1 %4303 }
0x10b6   :  { %v4306_v10 = vmul.f32 0.03125, %v4304_v9 }
0x10b7   :  { %v4301_v11 = vpop.xlane.xlu0 %4300 }
0x10b8   :  { %v4308_v12 = vsub.f32 %v6342_v5, %v4306_v10  ;;  %v4305_v14 = vmul.f32 0.03125, %v4301_v11 }
0x10ba   :  { %v4307_v31 = vsub.f32 %v6345_v48, %v4305_v14  ;;  %v4310_v15 = vmul.f32 %v4308_v12, %v4308_v12 }
0x10bc   :  { %v4314_v34 = vsel %vm23_vm0, %v4310_v15, 0.0  ;;  %v4309_v13 = vmul.f32 %v4307_v31, %v4307_v31 }
0x10bd   :  { %4315 = vadd.xlane.f32.xlu1 %v4314_v34 }
0x10be   :  { %v4311_v16 = vsel %vm23_vm0, %v4309_v13, 0.0 }
0x10bf   :  { %4312 = vadd.xlane.f32.xlu0 %v4311_v16 }
0x1146   :  { %v4316_v27 = vpop.xlane.xlu1 %4315 }
0x1147   :  { %v4318_v29 = vmul.f32 0.032258064, %v4316_v27 }
0x1148   :  { %v4313_v30 = vpop.xlane.xlu0 %4312 }
0x1149   :  { %5465 = vrsqrt.f32 %v4318_v29  ;;  %v4317_v49 = vmul.f32 0.032258064, %v4313_v30  ;;  %vm4328_vm11 = vcmp.eq.f32.partialorder %v4318_v29, inf  ;;  %v4331_v19 = vand.u32 2147483648, %v4318_v29 }
0x114a   :  { %vm4330_vm12 = vcmp.eq.f32.partialorder %v4318_v29, 0.0 }
0x114b   :  { %5467 = vrsqrt.f32 %v4317_v49  ;;  %vm4321_vm13 = vcmp.eq.f32.partialorder %v4317_v49, inf  ;;  %v4324_v45 = vand.u32 2147483648, %v4317_v49  ;;  %vm4323_vm14 = vcmp.eq.f32.partialorder %v4317_v49, 0.0 }
0x1156   :  { %v5466_v28 = vpop.eup %5465 }
0x1157   :  { %v4327_v33 = vmul.f32 %v5466_v28, %v4318_v29 }
0x1158   :  { %v5468_v54 = vpop.eup %5467 }
0x1159   :  { %v4329_v36 = vsel %vm4328_vm11, %v4318_v29, %v4327_v33  ;;  %v4320_v39 = vmul.f32 %v5468_v54, %v4317_v49 }
0x115a   :  { %v4332_v37 = vsel %vm4330_vm12, %v4331_v19, %v4329_v36 }
0x115b   :  { %v4335_v1 = vadd.f32 1e-06, %v4332_v37  ;;  %v4322_v23 = vsel %vm4321_vm13, %v4317_v49, %v4320_v39 }
0x115c   :  { %v4325_v40 = vsel %vm4323_vm14, %v4324_v45, %v4322_v23 }
0x115d   :  { %5469 = vrcp.f32 %v4335_v1  ;;  %v4334_v43 = vadd.f32 1e-06, %v4325_v40 }
0x115f   :  { %5471 = vrcp.f32 %v4334_v43 }
0x116a   :  { %v5470_v42 = vpop.eup %5469 }
0x116b   :  { %v4339_v44 = vmul.f32 %v5470_v42, %v4308_v12 }
0x116c   :  { %v5472_v47 = vpop.eup %5471 }
0x116d   :  { %v4338_v51 = vmul.f32 %v5472_v47, %v4307_v31  ;;  %v4345_v52 = vmul.f32 %v4680_v46, %v4339_v44 }
0x116f   :  { %v4344_v53 = vmul.f32 %v4680_v46, %v4338_v51  ;;  %v4352_v32 = vadd.f32 %v4681_v55, %v4345_v52 }
0x1171   :  { %v4351_v56 = vadd.f32 %v4681_v55, %v4344_v53 }
0x1173   :  { %5360 = vmatprep.mubr.msk.f32.mxu0 %vm23_vm0, %v4351_v56 }
0x1174   :  { %5361 = vmatmul.mubr.msk.f32.vlgmr.msra.gmra.mxu0 %vm23_vm0, %v4352_v32 }
0x1234   :  { %v5362_v50 = vpop.f32.mrf.mxu0 }
0x1235   :  { %v4440_v63 = vadd.f32 %v5362_v50, %v4682_v62 }
0x1236   :  { %v4434_v0 = vpop.f32.mrf.mxu0 }
0x1237   :  { %v4435_v2 = vadd.f32 %v4682_v62, %v4434_v0  ;;  %v4444_v38 = vmax.f32 %v4440_v63, 0.0 }
0x1239   :  { %v4443_v35 = vmax.f32 %v4435_v2, 0.0 }
0x123b   :  { %5379 = vmatprep.mubr.msk.f32.mxu1 %vm4453_vm15, %v4443_v35 }
0x123c   :  { %5380 = vmatmul.mubr.msk.f32.vlgmr.msra.gmra.mxu1 %vm4453_vm15, %v4444_v38 }
0x12fc   :  { %v5381_v3 = vpop.f32.mrf.mxu1 }
0x12fd   :  { %v4536_v61 = vadd.f32 %v5381_v3, %v6342_v5 }
0x12fe   :  { %v4526_v41 = vpop.f32.mrf.mxu1 }
0x12ff   :  { %v4543_v6 = vadd.f32 %v4687_v4, %v4536_v61  ;;  %v4535_v7 = vadd.f32 %v4526_v41, %v6345_v48 }
0x1301   :  { %4545 = vst.msk [vmem:[#allocation2 + $0x8] sm:$0xff] %vm23_vm0, %v4543_v6  ;;  %v4542_v8 = vadd.f32 %v4687_v4, %v4535_v7 }
0x1303   :  { %4544 = vst.msk [vmem:[#allocation2] sm:$0xff] %vm23_vm0, %v4542_v8 }
0x1304   :  { %5485 = shalt.err (!%p5482_p4)
}
0x1305   :  { %s5497_s2 = smov 128   ;;  %s5498_s26 = smov 8  }
0x1306   :  { %4557 = dma.vmem_to_hbm [thread:$0]  %s4552_s24, 256, %s6415_s3, [#allocation3], %s5497_s2, %s5497_s2, %s5498_s26  }
0x1307   :  { %5494 = dma.done.wait [#allocation3], 256  }
0x1308   :  { %5495 = vsyncadd [#allocation3], 4294967040 }
0x1309   :  { %4561 = vsyncpa [#allocation3], 1 }

</bundles_post_ra>
